<compile_context>
chip_gen: v5e
topology: v5e:2x2
jax: 0.10.0
libtpu: 0.0.40
codegen_flags: <defaults>
</compile_context>

<pallas_src>
import math

import jax
import jax.numpy as jnp
from jax.experimental import pallas as pl
from jax.experimental.pallas import tpu as pltpu


# --------------------------------------------------------------------------
# Fused kernel: all GRU layers + last-timestep FC in one pallas_call.
# --------------------------------------------------------------------------
def _make_fused_gru_kernel(T, Bp, H, n_layers):
    """Build the kernel body for static (T, Bp, H, n_layers)."""

    def kernel(*refs):
        x_ref = refs[0]                               # (T*Bp, E)   time-major, flattened
        layer_refs = refs[1:1 + 4 * n_layers]         # per layer: w_ih_t, b_ih, w_hh_t, b_hh
        w_fc_ref = refs[1 + 4 * n_layers]             # (H, O)
        b_fc_ref = refs[2 + 4 * n_layers]             # (1, O)
        out_ref = refs[3 + 4 * n_layers]              # (Bp, O)
        gi_scr = refs[4 + 4 * n_layers]               # (T*Bp, 3H) hoisted input projections
        hseq_scr = refs[5 + 4 * n_layers]             # (T*Bp, H)  inter-layer activations

        h = jnp.zeros((Bp, H), jnp.float32)
        for l in range(n_layers):
            w_ih_ref, b_ih_ref, w_hh_ref, b_hh_ref = layer_refs[4 * l:4 * l + 4]

            # ---- hoisted input projection: ONE big MXU matmul for the whole sequence,
            #      b_ih folded in (legal for GRU: only b_hh couples with r).
            seq_in = x_ref[...] if l == 0 else hseq_scr[...]
            gi_scr[...] = (
                jnp.dot(seq_in, w_ih_ref[...], preferred_element_type=jnp.float32)
                + b_ih_ref[...]
            )

            # ---- serial recurrence: per step only (Bp,H)x(H,3H) + gate math.
            #      T is small and static -> fully unrolled for LLO visibility.
            h = jnp.zeros((Bp, H), jnp.float32)
            for t in range(T):
                gin = gi_scr[t * Bp:(t + 1) * Bp, :]                        # (Bp, 3H)
                hg = (
                    jnp.dot(h, w_hh_ref[...], preferred_element_type=jnp.float32)
                    + b_hh_ref[...]
                )                                                           # (Bp, 3H)
                r = jax.nn.sigmoid(gin[:, 0:H] + hg[:, 0:H])
                z = jax.nn.sigmoid(gin[:, H:2 * H] + hg[:, H:2 * H])
                n = jnp.tanh(gin[:, 2 * H:3 * H] + r * hg[:, 2 * H:3 * H])
                h = (1.0 - z) * n + z * h
                if l < n_layers - 1:
                    # only non-final layers need their full output sequence
                    hseq_scr[t * Bp:(t + 1) * Bp, :] = h

        # ---- fused FC on the last timestep's hidden state (the only HBM write).
        out_ref[...] = (
            jnp.dot(h, w_fc_ref[...], preferred_element_type=jnp.float32)
            + b_fc_ref[...]
        )

    return kernel


def _fused_gru_call(x_flat, flat_weights, T, Bp, E, H, O, n_layers):
    num_inputs = 1 + 4 * n_layers + 2
    return pl.pallas_call(
        _make_fused_gru_kernel(T, Bp, H, n_layers),
        out_shape=jax.ShapeDtypeStruct((Bp, O), jnp.float32),
        in_specs=[pl.BlockSpec(memory_space=pltpu.MemorySpace.VMEM)] * num_inputs,
        out_specs=pl.BlockSpec(memory_space=pltpu.MemorySpace.VMEM),
        scratch_shapes=[
            pltpu.VMEM((T * Bp, 3 * H), jnp.float32),   # hoisted input projections
            pltpu.VMEM((T * Bp, H), jnp.float32),       # inter-layer activation sequence
        ],
    )(x_flat, *flat_weights)


# --------------------------------------------------------------------------
# Parameter construction (deterministic, PyTorch-style init).
# --------------------------------------------------------------------------
def init_params(key, num_embedding, output_size, embedding_dim, hidden_dim, n_layers):
    params = {}
    k_emb, k_gru, k_fc = jax.random.split(key, 3)

    # nn.Embedding: N(0, 1)
    params["embedding"] = jax.random.normal(
        k_emb, (num_embedding, embedding_dim), dtype=jnp.float32
    )

    # nn.GRU: uniform(-1/sqrt(H), 1/sqrt(H)); gate order in the packed dim is [r | z | n]
    bound = 1.0 / math.sqrt(hidden_dim)
    layers = []
    keys = jax.random.split(k_gru, n_layers)
    for l in range(n_layers):
        in_dim = embedding_dim if l == 0 else hidden_dim
        kk = jax.random.split(keys[l], 4)
        w_ih = jax.random.uniform(kk[0], (3 * hidden_dim, in_dim), jnp.float32, -bound, bound)
        w_hh = jax.random.uniform(kk[1], (3 * hidden_dim, hidden_dim), jnp.float32, -bound, bound)
        b_ih = jax.random.uniform(kk[2], (3 * hidden_dim,), jnp.float32, -bound, bound)
        b_hh = jax.random.uniform(kk[3], (3 * hidden_dim,), jnp.float32, -bound, bound)
        layers.append(
            dict(
                w_ih_t=jnp.transpose(w_ih),                      # (in_dim, 3H)
                b_ih=b_ih.reshape(1, 3 * hidden_dim),            # (1, 3H)
                w_hh_t=jnp.transpose(w_hh),                      # (H, 3H)
                b_hh=b_hh.reshape(1, 3 * hidden_dim),            # (1, 3H) kept separate (b_hn)
            )
        )
    params["gru"] = layers

    # nn.Linear: uniform(-1/sqrt(H), 1/sqrt(H))
    fcb = 1.0 / math.sqrt(hidden_dim)
    kf1, kf2 = jax.random.split(k_fc)
    w_fc = jax.random.uniform(kf1, (output_size, hidden_dim), jnp.float32, -fcb, fcb)
    b_fc = jax.random.uniform(kf2, (output_size,), jnp.float32, -fcb, fcb)
    params["fc_w_t"] = jnp.transpose(w_fc)              # (H, O)
    params["fc_b"] = b_fc.reshape(1, output_size)       # (1, O)
    return params


# --------------------------------------------------------------------------
# Full forward pass (mirrors the PyTorch GRU.forward, eval mode).
# --------------------------------------------------------------------------
def gru_forward(params, token_ids):
    # token_ids: (B, T) int32  (PyTorch: x.long())
    B, T = token_ids.shape
    embedding = params["embedding"]
    E = embedding.shape[1]
    layers = params["gru"]
    H = layers[0]["w_hh_t"].shape[0]
    n_layers = len(layers)
    O = params["fc_w_t"].shape[1]

    # Embedding lookup (gather) — plain-JAX glue.
    embeds = jnp.take(embedding, token_ids, axis=0)             # (B, T, E)

    # Time-major, batch padded to the f32 sublane count (8) for vreg-shaped tiles.
    x = jnp.transpose(embeds, (1, 0, 2)).astype(jnp.float32)    # (T, B, E)
    Bp = max(8, -(-B // 8) * 8)
    x = jnp.pad(x, ((0, 0), (0, Bp - B), (0, 0)))
    x_flat = x.reshape(T * Bp, E)

    flat_weights = []
    for layer in layers:
        flat_weights += [layer["w_ih_t"], layer["b_ih"], layer["w_hh_t"], layer["b_hh"]]
    flat_weights += [params["fc_w_t"], params["fc_b"]]

    out = _fused_gru_call(x_flat, flat_weights, T, Bp, E, H, O, n_layers)   # (Bp, O)
    return out[:B]


gru_model_forward = jax.jit(gru_forward)


# --------------------------------------------------------------------------
# Pure-JAX reference (same PyTorch GRU semantics) for a correctness check.
# --------------------------------------------------------------------------
def _gru_reference(params, token_ids):
    hp = jax.lax.Precision.HIGHEST
    embeds = jnp.take(params["embedding"], token_ids, axis=0).astype(jnp.float32)  # (B, T, E)
    B, T, _ = embeds.shape
    seq = embeds
    for layer in params["gru"]:
        H = layer["w_hh_t"].shape[0]
        h = jnp.zeros((B, H), jnp.float32)
        outs = []
        for t in range(T):
            gin = jnp.dot(seq[:, t, :], layer["w_ih_t"], precision=hp) + layer["b_ih"]
            hg = jnp.dot(h, layer["w_hh_t"], precision=hp) + layer["b_hh"]
            r = jax.nn.sigmoid(gin[:, 0:H] + hg[:, 0:H])
            z = jax.nn.sigmoid(gin[:, H:2 * H] + hg[:, H:2 * H])
            n = jnp.tanh(gin[:, 2 * H:3 * H] + r * hg[:, 2 * H:3 * H])
            h = (1.0 - z) * n + z * h
            outs.append(h)
        seq = jnp.stack(outs, axis=1)
    return jnp.dot(seq[:, -1, :], params["fc_w_t"], precision=hp) + params["fc_b"]


if __name__ == "__main__":
    # Small, forward-consistent shapes.
    NUM_EMBEDDING = 50     # vocab size
    OUTPUT_SIZE = 4
    EMBEDDING_DIM = 32
    HIDDEN_DIM = 32
    N_LAYERS = 2
    BATCH = 2
    SEQ = 8

    key = jax.random.PRNGKey(0)
    k_params, k_tokens = jax.random.split(key)

    params = init_params(
        k_params, NUM_EMBEDDING, OUTPUT_SIZE, EMBEDDING_DIM, HIDDEN_DIM, N_LAYERS
    )
    token_ids = jax.random.randint(k_tokens, (BATCH, SEQ), 0, NUM_EMBEDDING, dtype=jnp.int32)

    out = gru_model_forward(params, token_ids)
    out = jax.block_until_ready(out)
    assert out.shape == (BATCH, OUTPUT_SIZE), out.shape
    assert bool(jnp.all(jnp.isfinite(out))), "non-finite output"

    ref = _gru_reference(params, token_ids)
    assert bool(jnp.allclose(out, ref, atol=1e-4, rtol=1e-4)), "kernel/reference mismatch"

    print("KERNEL_OK")
</pallas_src>

<mosaic_0001>
module attributes {stable_mosaic.version = 11 : i64} {
  func.func @kernel(%arg0: memref<64x32xf32, #tpu.memory_space<vmem>>, %arg1: memref<32x96xf32, #tpu.memory_space<vmem>>, %arg2: memref<1x96xf32, #tpu.memory_space<vmem>>, %arg3: memref<32x96xf32, #tpu.memory_space<vmem>>, %arg4: memref<1x96xf32, #tpu.memory_space<vmem>>, %arg5: memref<32x96xf32, #tpu.memory_space<vmem>>, %arg6: memref<1x96xf32, #tpu.memory_space<vmem>>, %arg7: memref<32x96xf32, #tpu.memory_space<vmem>>, %arg8: memref<1x96xf32, #tpu.memory_space<vmem>>, %arg9: memref<32x4xf32, #tpu.memory_space<vmem>>, %arg10: memref<1x4xf32, #tpu.memory_space<vmem>>, %arg11: memref<8x4xf32, #tpu.memory_space<vmem>>, %arg12: memref<64x96xf32, #tpu.memory_space<vmem>>, %arg13: memref<64x32xf32, #tpu.memory_space<vmem>>) attributes {dimension_semantics = [], scalar_prefetch = 0 : i64, scratch_operands = 2 : i64, tpu.core_type = #tpu.core_type<tc>} {
    %c0 = arith.constant 0 : index
    %c0_0 = arith.constant 0 : index
    %0 = vector.load %arg0[%c0, %c0_0] : memref<64x32xf32, #tpu.memory_space<vmem>>, vector<64x32xf32>
    %c0_1 = arith.constant 0 : index
    %c0_2 = arith.constant 0 : index
    %1 = vector.load %arg1[%c0_1, %c0_2] : memref<32x96xf32, #tpu.memory_space<vmem>>, vector<32x96xf32>
    %cst = arith.constant dense<0.000000e+00> : vector<64x96xf32>
    %2 = tpu.matmul %0, %1, %cst {dimension_numbers = #tpu.dot_dimension_numbers<[1], [0], [0], [1], [0, 0, 1, 1], [], []>} : vector<64x32xf32>, vector<32x96xf32>, vector<64x96xf32> -> vector<64x96xf32>
    %c0_3 = arith.constant 0 : index
    %c0_4 = arith.constant 0 : index
    %3 = vector.load %arg2[%c0_3, %c0_4] : memref<1x96xf32, #tpu.memory_space<vmem>>, vector<1x96xf32>
    %4 = vector.broadcast %3 : vector<1x96xf32> to vector<64x96xf32>
    %5 = arith.addf %2, %4 : vector<64x96xf32>
    %c0_5 = arith.constant 0 : index
    %c0_6 = arith.constant 0 : index
    %6 = vector.load %arg12[%c0_5, %c0_6] : memref<64x96xf32, #tpu.memory_space<vmem>>, vector<64x96xf32>
    tpu.vector_store %arg12[%c0_5, %c0_6], %5 {strides = array<i32>} : memref<64x96xf32, #tpu.memory_space<vmem>>, vector<64x96xf32>,
    %cst_7 = arith.constant 0.000000e+00 : f32
    %7 = vector.broadcast %cst_7 : f32 to vector<8x32xf32>
    %c0_8 = arith.constant 0 : index
    %c0_9 = arith.constant 0 : index
    %8 = vector.load %arg12[%c0_8, %c0_9] : memref<64x96xf32, #tpu.memory_space<vmem>>, vector<8x96xf32>
    %c0_10 = arith.constant 0 : index
    %c0_11 = arith.constant 0 : index
    %9 = vector.load %arg3[%c0_10, %c0_11] : memref<32x96xf32, #tpu.memory_space<vmem>>, vector<32x96xf32>
    %cst_12 = arith.constant dense<0.000000e+00> : vector<8x96xf32>
    %10 = tpu.matmul %7, %9, %cst_12 {dimension_numbers = #tpu.dot_dimension_numbers<[1], [0], [0], [1], [0, 0, 1, 1], [], []>} : vector<8x32xf32>, vector<32x96xf32>, vector<8x96xf32> -> vector<8x96xf32>
    %c0_13 = arith.constant 0 : index
    %c0_14 = arith.constant 0 : index
    %11 = vector.load %arg4[%c0_13, %c0_14] : memref<1x96xf32, #tpu.memory_space<vmem>>, vector<1x96xf32>
    %12 = vector.broadcast %11 : vector<1x96xf32> to vector<8x96xf32>
    %13 = arith.addf %10, %12 : vector<8x96xf32>
    %14 = vector.extract_strided_slice %8 {offsets = [0, 0], sizes = [8, 32], strides = [1, 1]} : vector<8x96xf32> to vector<8x32xf32>
    %15 = vector.extract_strided_slice %13 {offsets = [0, 0], sizes = [8, 32], strides = [1, 1]} : vector<8x96xf32> to vector<8x32xf32>
    %16 = arith.addf %14, %15 : vector<8x32xf32>
    %17 = arith.negf %16 : vector<8x32xf32>
    %18 = math.exp %17 : vector<8x32xf32>
    %cst_15 = arith.constant 1.000000e+00 : f32
    %19 = vector.broadcast %cst_15 : f32 to vector<8x32xf32>
    %20 = arith.addf %19, %18 : vector<8x32xf32>
    %21 = arith.divf %19, %20 : vector<8x32xf32>
    %22 = vector.extract_strided_slice %8 {offsets = [0, 32], sizes = [8, 32], strides = [1, 1]} : vector<8x96xf32> to vector<8x32xf32>
    %23 = vector.extract_strided_slice %13 {offsets = [0, 32], sizes = [8, 32], strides = [1, 1]} : vector<8x96xf32> to vector<8x32xf32>
    %24 = arith.addf %22, %23 : vector<8x32xf32>
    %25 = arith.negf %24 : vector<8x32xf32>
    %26 = math.exp %25 : vector<8x32xf32>
    %cst_16 = arith.constant 1.000000e+00 : f32
    %27 = vector.broadcast %cst_16 : f32 to vector<8x32xf32>
    %28 = arith.addf %27, %26 : vector<8x32xf32>
    %29 = arith.divf %27, %28 : vector<8x32xf32>
    %30 = vector.extract_strided_slice %8 {offsets = [0, 64], sizes = [8, 32], strides = [1, 1]} : vector<8x96xf32> to vector<8x32xf32>
    %31 = vector.extract_strided_slice %13 {offsets = [0, 64], sizes = [8, 32], strides = [1, 1]} : vector<8x96xf32> to vector<8x32xf32>
    %32 = arith.mulf %21, %31 : vector<8x32xf32>
    %33 = arith.addf %30, %32 : vector<8x32xf32>
    %34 = math.tanh %33 : vector<8x32xf32>
    %cst_17 = arith.constant 1.000000e+00 : f32
    %35 = vector.broadcast %cst_17 : f32 to vector<8x32xf32>
    %36 = arith.subf %35, %29 : vector<8x32xf32>
    %37 = arith.mulf %36, %34 : vector<8x32xf32>
    %38 = arith.mulf %29, %7 : vector<8x32xf32>
    %39 = arith.addf %37, %38 : vector<8x32xf32>
    %c0_18 = arith.constant 0 : index
    %c0_19 = arith.constant 0 : index
    %40 = vector.load %arg13[%c0_18, %c0_19] : memref<64x32xf32, #tpu.memory_space<vmem>>, vector<8x32xf32>
    tpu.vector_store %arg13[%c0_18, %c0_19], %39 {strides = array<i32>} : memref<64x32xf32, #tpu.memory_space<vmem>>, vector<8x32xf32>,
    %c8 = arith.constant 8 : index
    %c0_20 = arith.constant 0 : index
    %41 = vector.load %arg12[%c8, %c0_20] : memref<64x96xf32, #tpu.memory_space<vmem>>, vector<8x96xf32>
    %c0_21 = arith.constant 0 : index
    %c0_22 = arith.constant 0 : index
    %42 = vector.load %arg3[%c0_21, %c0_22] : memref<32x96xf32, #tpu.memory_space<vmem>>, vector<32x96xf32>
    %cst_23 = arith.constant dense<0.000000e+00> : vector<8x96xf32>
    %43 = tpu.matmul %39, %42, %cst_23 {dimension_numbers = #tpu.dot_dimension_numbers<[1], [0], [0], [1], [0, 0, 1, 1], [], []>} : vector<8x32xf32>, vector<32x96xf32>, vector<8x96xf32> -> vector<8x96xf32>
    %c0_24 = arith.constant 0 : index
    %c0_25 = arith.constant 0 : index
    %44 = vector.load %arg4[%c0_24, %c0_25] : memref<1x96xf32, #tpu.memory_space<vmem>>, vector<1x96xf32>
    %45 = vector.broadcast %44 : vector<1x96xf32> to vector<8x96xf32>
    %46 = arith.addf %43, %45 : vector<8x96xf32>
    %47 = vector.extract_strided_slice %41 {offsets = [0, 0], sizes = [8, 32], strides = [1, 1]} : vector<8x96xf32> to vector<8x32xf32>
    %48 = vector.extract_strided_slice %46 {offsets = [0, 0], sizes = [8, 32], strides = [1, 1]} : vector<8x96xf32> to vector<8x32xf32>
    %49 = arith.addf %47, %48 : vector<8x32xf32>
    %50 = arith.negf %49 : vector<8x32xf32>
    %51 = math.exp %50 : vector<8x32xf32>
    %cst_26 = arith.constant 1.000000e+00 : f32
    %52 = vector.broadcast %cst_26 : f32 to vector<8x32xf32>
    %53 = arith.addf %52, %51 : vector<8x32xf32>
    %54 = arith.divf %52, %53 : vector<8x32xf32>
    %55 = vector.extract_strided_slice %41 {offsets = [0, 32], sizes = [8, 32], strides = [1, 1]} : vector<8x96xf32> to vector<8x32xf32>
    %56 = vector.extract_strided_slice %46 {offsets = [0, 32], sizes = [8, 32], strides = [1, 1]} : vector<8x96xf32> to vector<8x32xf32>
    %57 = arith.addf %55, %56 : vector<8x32xf32>
    %58 = arith.negf %57 : vector<8x32xf32>
    %59 = math.exp %58 : vector<8x32xf32>
    %cst_27 = arith.constant 1.000000e+00 : f32
    %60 = vector.broadcast %cst_27 : f32 to vector<8x32xf32>
    %61 = arith.addf %60, %59 : vector<8x32xf32>
    %62 = arith.divf %60, %61 : vector<8x32xf32>
    %63 = vector.extract_strided_slice %41 {offsets = [0, 64], sizes = [8, 32], strides = [1, 1]} : vector<8x96xf32> to vector<8x32xf32>
    %64 = vector.extract_strided_slice %46 {offsets = [0, 64], sizes = [8, 32], strides = [1, 1]} : vector<8x96xf32> to vector<8x32xf32>
    %65 = arith.mulf %54, %64 : vector<8x32xf32>
    %66 = arith.addf %63, %65 : vector<8x32xf32>
    %67 = math.tanh %66 : vector<8x32xf32>
    %cst_28 = arith.constant 1.000000e+00 : f32
    %68 = vector.broadcast %cst_28 : f32 to vector<8x32xf32>
    %69 = arith.subf %68, %62 : vector<8x32xf32>
    %70 = arith.mulf %69, %67 : vector<8x32xf32>
    %71 = arith.mulf %62, %39 : vector<8x32xf32>
    %72 = arith.addf %70, %71 : vector<8x32xf32>
    %c8_29 = arith.constant 8 : index
    %c0_30 = arith.constant 0 : index
    %73 = vector.load %arg13[%c8_29, %c0_30] : memref<64x32xf32, #tpu.memory_space<vmem>>, vector<8x32xf32>
    tpu.vector_store %arg13[%c8_29, %c0_30], %72 {strides = array<i32>} : memref<64x32xf32, #tpu.memory_space<vmem>>, vector<8x32xf32>,
    %c16 = arith.constant 16 : index
    %c0_31 = arith.constant 0 : index
    %74 = vector.load %arg12[%c16, %c0_31] : memref<64x96xf32, #tpu.memory_space<vmem>>, vector<8x96xf32>
    %c0_32 = arith.constant 0 : index
    %c0_33 = arith.constant 0 : index
    %75 = vector.load %arg3[%c0_32, %c0_33] : memref<32x96xf32, #tpu.memory_space<vmem>>, vector<32x96xf32>
    %cst_34 = arith.constant dense<0.000000e+00> : vector<8x96xf32>
    %76 = tpu.matmul %72, %75, %cst_34 {dimension_numbers = #tpu.dot_dimension_numbers<[1], [0], [0], [1], [0, 0, 1, 1], [], []>} : vector<8x32xf32>, vector<32x96xf32>, vector<8x96xf32> -> vector<8x96xf32>
    %c0_35 = arith.constant 0 : index
    %c0_36 = arith.constant 0 : index
    %77 = vector.load %arg4[%c0_35, %c0_36] : memref<1x96xf32, #tpu.memory_space<vmem>>, vector<1x96xf32>
    %78 = vector.broadcast %77 : vector<1x96xf32> to vector<8x96xf32>
    %79 = arith.addf %76, %78 : vector<8x96xf32>
    %80 = vector.extract_strided_slice %74 {offsets = [0, 0], sizes = [8, 32], strides = [1, 1]} : vector<8x96xf32> to vector<8x32xf32>
    %81 = vector.extract_strided_slice %79 {offsets = [0, 0], sizes = [8, 32], strides = [1, 1]} : vector<8x96xf32> to vector<8x32xf32>
    %82 = arith.addf %80, %81 : vector<8x32xf32>
    %83 = arith.negf %82 : vector<8x32xf32>
    %84 = math.exp %83 : vector<8x32xf32>
    %cst_37 = arith.constant 1.000000e+00 : f32
    %85 = vector.broadcast %cst_37 : f32 to vector<8x32xf32>
    %86 = arith.addf %85, %84 : vector<8x32xf32>
    %87 = arith.divf %85, %86 : vector<8x32xf32>
    %88 = vector.extract_strided_slice %74 {offsets = [0, 32], sizes = [8, 32], strides = [1, 1]} : vector<8x96xf32> to vector<8x32xf32>
    %89 = vector.extract_strided_slice %79 {offsets = [0, 32], sizes = [8, 32], strides = [1, 1]} : vector<8x96xf32> to vector<8x32xf32>
    %90 = arith.addf %88, %89 : vector<8x32xf32>
    %91 = arith.negf %90 : vector<8x32xf32>
    %92 = math.exp %91 : vector<8x32xf32>
    %cst_38 = arith.constant 1.000000e+00 : f32
    %93 = vector.broadcast %cst_38 : f32 to vector<8x32xf32>
    %94 = arith.addf %93, %92 : vector<8x32xf32>
    %95 = arith.divf %93, %94 : vector<8x32xf32>
    %96 = vector.extract_strided_slice %74 {offsets = [0, 64], sizes = [8, 32], strides = [1, 1]} : vector<8x96xf32> to vector<8x32xf32>
    %97 = vector.extract_strided_slice %79 {offsets = [0, 64], sizes = [8, 32], strides = [1, 1]} : vector<8x96xf32> to vector<8x32xf32>
    %98 = arith.mulf %87, %97 : vector<8x32xf32>
    %99 = arith.addf %96, %98 : vector<8x32xf32>
    %100 = math.tanh %99 : vector<8x32xf32>
    %cst_39 = arith.constant 1.000000e+00 : f32
    %101 = vector.broadcast %cst_39 : f32 to vector<8x32xf32>
    %102 = arith.subf %101, %95 : vector<8x32xf32>
    %103 = arith.mulf %102, %100 : vector<8x32xf32>
    %104 = arith.mulf %95, %72 : vector<8x32xf32>
    %105 = arith.addf %103, %104 : vector<8x32xf32>
    %c16_40 = arith.constant 16 : index
    %c0_41 = arith.constant 0 : index
    %106 = vector.load %arg13[%c16_40, %c0_41] : memref<64x32xf32, #tpu.memory_space<vmem>>, vector<8x32xf32>
    tpu.vector_store %arg13[%c16_40, %c0_41], %105 {strides = array<i32>} : memref<64x32xf32, #tpu.memory_space<vmem>>, vector<8x32xf32>,
    %c24 = arith.constant 24 : index
    %c0_42 = arith.constant 0 : index
    %107 = vector.load %arg12[%c24, %c0_42] : memref<64x96xf32, #tpu.memory_space<vmem>>, vector<8x96xf32>
    %c0_43 = arith.constant 0 : index
    %c0_44 = arith.constant 0 : index
    %108 = vector.load %arg3[%c0_43, %c0_44] : memref<32x96xf32, #tpu.memory_space<vmem>>, vector<32x96xf32>
    %cst_45 = arith.constant dense<0.000000e+00> : vector<8x96xf32>
    %109 = tpu.matmul %105, %108, %cst_45 {dimension_numbers = #tpu.dot_dimension_numbers<[1], [0], [0], [1], [0, 0, 1, 1], [], []>} : vector<8x32xf32>, vector<32x96xf32>, vector<8x96xf32> -> vector<8x96xf32>
    %c0_46 = arith.constant 0 : index
    %c0_47 = arith.constant 0 : index
    %110 = vector.load %arg4[%c0_46, %c0_47] : memref<1x96xf32, #tpu.memory_space<vmem>>, vector<1x96xf32>
    %111 = vector.broadcast %110 : vector<1x96xf32> to vector<8x96xf32>
    %112 = arith.addf %109, %111 : vector<8x96xf32>
    %113 = vector.extract_strided_slice %107 {offsets = [0, 0], sizes = [8, 32], strides = [1, 1]} : vector<8x96xf32> to vector<8x32xf32>
    %114 = vector.extract_strided_slice %112 {offsets = [0, 0], sizes = [8, 32], strides = [1, 1]} : vector<8x96xf32> to vector<8x32xf32>
    %115 = arith.addf %113, %114 : vector<8x32xf32>
    %116 = arith.negf %115 : vector<8x32xf32>
    %117 = math.exp %116 : vector<8x32xf32>
    %cst_48 = arith.constant 1.000000e+00 : f32
    %118 = vector.broadcast %cst_48 : f32 to vector<8x32xf32>
    %119 = arith.addf %118, %117 : vector<8x32xf32>
    %120 = arith.divf %118, %119 : vector<8x32xf32>
    %121 = vector.extract_strided_slice %107 {offsets = [0, 32], sizes = [8, 32], strides = [1, 1]} : vector<8x96xf32> to vector<8x32xf32>
    %122 = vector.extract_strided_slice %112 {offsets = [0, 32], sizes = [8, 32], strides = [1, 1]} : vector<8x96xf32> to vector<8x32xf32>
    %123 = arith.addf %121, %122 : vector<8x32xf32>
    %124 = arith.negf %123 : vector<8x32xf32>
    %125 = math.exp %124 : vector<8x32xf32>
    %cst_49 = arith.constant 1.000000e+00 : f32
    %126 = vector.broadcast %cst_49 : f32 to vector<8x32xf32>
    %127 = arith.addf %126, %125 : vector<8x32xf32>
    %128 = arith.divf %126, %127 : vector<8x32xf32>
    %129 = vector.extract_strided_slice %107 {offsets = [0, 64], sizes = [8, 32], strides = [1, 1]} : vector<8x96xf32> to vector<8x32xf32>
    %130 = vector.extract_strided_slice %112 {offsets = [0, 64], sizes = [8, 32], strides = [1, 1]} : vector<8x96xf32> to vector<8x32xf32>
    %131 = arith.mulf %120, %130 : vector<8x32xf32>
    %132 = arith.addf %129, %131 : vector<8x32xf32>
    %133 = math.tanh %132 : vector<8x32xf32>
    %cst_50 = arith.constant 1.000000e+00 : f32
    %134 = vector.broadcast %cst_50 : f32 to vector<8x32xf32>
    %135 = arith.subf %134, %128 : vector<8x32xf32>
    %136 = arith.mulf %135, %133 : vector<8x32xf32>
    %137 = arith.mulf %128, %105 : vector<8x32xf32>
    %138 = arith.addf %136, %137 : vector<8x32xf32>
    %c24_51 = arith.constant 24 : index
    %c0_52 = arith.constant 0 : index
    %139 = vector.load %arg13[%c24_51, %c0_52] : memref<64x32xf32, #tpu.memory_space<vmem>>, vector<8x32xf32>
    tpu.vector_store %arg13[%c24_51, %c0_52], %138 {strides = array<i32>} : memref<64x32xf32, #tpu.memory_space<vmem>>, vector<8x32xf32>,
    %c32 = arith.constant 32 : index
    %c0_53 = arith.constant 0 : index
    %140 = vector.load %arg12[%c32, %c0_53] : memref<64x96xf32, #tpu.memory_space<vmem>>, vector<8x96xf32>
    %c0_54 = arith.constant 0 : index
    %c0_55 = arith.constant 0 : index
    %141 = vector.load %arg3[%c0_54, %c0_55] : memref<32x96xf32, #tpu.memory_space<vmem>>, vector<32x96xf32>
    %cst_56 = arith.constant dense<0.000000e+00> : vector<8x96xf32>
    %142 = tpu.matmul %138, %141, %cst_56 {dimension_numbers = #tpu.dot_dimension_numbers<[1], [0], [0], [1], [0, 0, 1, 1], [], []>} : vector<8x32xf32>, vector<32x96xf32>, vector<8x96xf32> -> vector<8x96xf32>
    %c0_57 = arith.constant 0 : index
    %c0_58 = arith.constant 0 : index
    %143 = vector.load %arg4[%c0_57, %c0_58] : memref<1x96xf32, #tpu.memory_space<vmem>>, vector<1x96xf32>
    %144 = vector.broadcast %143 : vector<1x96xf32> to vector<8x96xf32>
    %145 = arith.addf %142, %144 : vector<8x96xf32>
    %146 = vector.extract_strided_slice %140 {offsets = [0, 0], sizes = [8, 32], strides = [1, 1]} : vector<8x96xf32> to vector<8x32xf32>
    %147 = vector.extract_strided_slice %145 {offsets = [0, 0], sizes = [8, 32], strides = [1, 1]} : vector<8x96xf32> to vector<8x32xf32>
    %148 = arith.addf %146, %147 : vector<8x32xf32>
    %149 = arith.negf %148 : vector<8x32xf32>
    %150 = math.exp %149 : vector<8x32xf32>
    %cst_59 = arith.constant 1.000000e+00 : f32
    %151 = vector.broadcast %cst_59 : f32 to vector<8x32xf32>
    %152 = arith.addf %151, %150 : vector<8x32xf32>
    %153 = arith.divf %151, %152 : vector<8x32xf32>
    %154 = vector.extract_strided_slice %140 {offsets = [0, 32], sizes = [8, 32], strides = [1, 1]} : vector<8x96xf32> to vector<8x32xf32>
    %155 = vector.extract_strided_slice %145 {offsets = [0, 32], sizes = [8, 32], strides = [1, 1]} : vector<8x96xf32> to vector<8x32xf32>
    %156 = arith.addf %154, %155 : vector<8x32xf32>
    %157 = arith.negf %156 : vector<8x32xf32>
    %158 = math.exp %157 : vector<8x32xf32>
    %cst_60 = arith.constant 1.000000e+00 : f32
    %159 = vector.broadcast %cst_60 : f32 to vector<8x32xf32>
    %160 = arith.addf %159, %158 : vector<8x32xf32>
    %161 = arith.divf %159, %160 : vector<8x32xf32>
    %162 = vector.extract_strided_slice %140 {offsets = [0, 64], sizes = [8, 32], strides = [1, 1]} : vector<8x96xf32> to vector<8x32xf32>
    %163 = vector.extract_strided_slice %145 {offsets = [0, 64], sizes = [8, 32], strides = [1, 1]} : vector<8x96xf32> to vector<8x32xf32>
    %164 = arith.mulf %153, %163 : vector<8x32xf32>
    %165 = arith.addf %162, %164 : vector<8x32xf32>
    %166 = math.tanh %165 : vector<8x32xf32>
    %cst_61 = arith.constant 1.000000e+00 : f32
    %167 = vector.broadcast %cst_61 : f32 to vector<8x32xf32>
    %168 = arith.subf %167, %161 : vector<8x32xf32>
    %169 = arith.mulf %168, %166 : vector<8x32xf32>
    %170 = arith.mulf %161, %138 : vector<8x32xf32>
    %171 = arith.addf %169, %170 : vector<8x32xf32>
    %c32_62 = arith.constant 32 : index
    %c0_63 = arith.constant 0 : index
    %172 = vector.load %arg13[%c32_62, %c0_63] : memref<64x32xf32, #tpu.memory_space<vmem>>, vector<8x32xf32>
    tpu.vector_store %arg13[%c32_62, %c0_63], %171 {strides = array<i32>} : memref<64x32xf32, #tpu.memory_space<vmem>>, vector<8x32xf32>,
    %c40 = arith.constant 40 : index
    %c0_64 = arith.constant 0 : index
    %173 = vector.load %arg12[%c40, %c0_64] : memref<64x96xf32, #tpu.memory_space<vmem>>, vector<8x96xf32>
    %c0_65 = arith.constant 0 : index
    %c0_66 = arith.constant 0 : index
    %174 = vector.load %arg3[%c0_65, %c0_66] : memref<32x96xf32, #tpu.memory_space<vmem>>, vector<32x96xf32>
    %cst_67 = arith.constant dense<0.000000e+00> : vector<8x96xf32>
    %175 = tpu.matmul %171, %174, %cst_67 {dimension_numbers = #tpu.dot_dimension_numbers<[1], [0], [0], [1], [0, 0, 1, 1], [], []>} : vector<8x32xf32>, vector<32x96xf32>, vector<8x96xf32> -> vector<8x96xf32>
    %c0_68 = arith.constant 0 : index
    %c0_69 = arith.constant 0 : index
    %176 = vector.load %arg4[%c0_68, %c0_69] : memref<1x96xf32, #tpu.memory_space<vmem>>, vector<1x96xf32>
    %177 = vector.broadcast %176 : vector<1x96xf32> to vector<8x96xf32>
    %178 = arith.addf %175, %177 : vector<8x96xf32>
    %179 = vector.extract_strided_slice %173 {offsets = [0, 0], sizes = [8, 32], strides = [1, 1]} : vector<8x96xf32> to vector<8x32xf32>
    %180 = vector.extract_strided_slice %178 {offsets = [0, 0], sizes = [8, 32], strides = [1, 1]} : vector<8x96xf32> to vector<8x32xf32>
    %181 = arith.addf %179, %180 : vector<8x32xf32>
    %182 = arith.negf %181 : vector<8x32xf32>
    %183 = math.exp %182 : vector<8x32xf32>
    %cst_70 = arith.constant 1.000000e+00 : f32
    %184 = vector.broadcast %cst_70 : f32 to vector<8x32xf32>
    %185 = arith.addf %184, %183 : vector<8x32xf32>
    %186 = arith.divf %184, %185 : vector<8x32xf32>
    %187 = vector.extract_strided_slice %173 {offsets = [0, 32], sizes = [8, 32], strides = [1, 1]} : vector<8x96xf32> to vector<8x32xf32>
    %188 = vector.extract_strided_slice %178 {offsets = [0, 32], sizes = [8, 32], strides = [1, 1]} : vector<8x96xf32> to vector<8x32xf32>
    %189 = arith.addf %187, %188 : vector<8x32xf32>
    %190 = arith.negf %189 : vector<8x32xf32>
    %191 = math.exp %190 : vector<8x32xf32>
    %cst_71 = arith.constant 1.000000e+00 : f32
    %192 = vector.broadcast %cst_71 : f32 to vector<8x32xf32>
    %193 = arith.addf %192, %191 : vector<8x32xf32>
    %194 = arith.divf %192, %193 : vector<8x32xf32>
    %195 = vector.extract_strided_slice %173 {offsets = [0, 64], sizes = [8, 32], strides = [1, 1]} : vector<8x96xf32> to vector<8x32xf32>
    %196 = vector.extract_strided_slice %178 {offsets = [0, 64], sizes = [8, 32], strides = [1, 1]} : vector<8x96xf32> to vector<8x32xf32>
    %197 = arith.mulf %186, %196 : vector<8x32xf32>
    %198 = arith.addf %195, %197 : vector<8x32xf32>
    %199 = math.tanh %198 : vector<8x32xf32>
    %cst_72 = arith.constant 1.000000e+00 : f32
    %200 = vector.broadcast %cst_72 : f32 to vector<8x32xf32>
    %201 = arith.subf %200, %194 : vector<8x32xf32>
    %202 = arith.mulf %201, %199 : vector<8x32xf32>
    %203 = arith.mulf %194, %171 : vector<8x32xf32>
    %204 = arith.addf %202, %203 : vector<8x32xf32>
    %c40_73 = arith.constant 40 : index
    %c0_74 = arith.constant 0 : index
    %205 = vector.load %arg13[%c40_73, %c0_74] : memref<64x32xf32, #tpu.memory_space<vmem>>, vector<8x32xf32>
    tpu.vector_store %arg13[%c40_73, %c0_74], %204 {strides = array<i32>} : memref<64x32xf32, #tpu.memory_space<vmem>>, vector<8x32xf32>,
    %c48 = arith.constant 48 : index
    %c0_75 = arith.constant 0 : index
    %206 = vector.load %arg12[%c48, %c0_75] : memref<64x96xf32, #tpu.memory_space<vmem>>, vector<8x96xf32>
    %c0_76 = arith.constant 0 : index
    %c0_77 = arith.constant 0 : index
    %207 = vector.load %arg3[%c0_76, %c0_77] : memref<32x96xf32, #tpu.memory_space<vmem>>, vector<32x96xf32>
    %cst_78 = arith.constant dense<0.000000e+00> : vector<8x96xf32>
    %208 = tpu.matmul %204, %207, %cst_78 {dimension_numbers = #tpu.dot_dimension_numbers<[1], [0], [0], [1], [0, 0, 1, 1], [], []>} : vector<8x32xf32>, vector<32x96xf32>, vector<8x96xf32> -> vector<8x96xf32>
    %c0_79 = arith.constant 0 : index
    %c0_80 = arith.constant 0 : index
    %209 = vector.load %arg4[%c0_79, %c0_80] : memref<1x96xf32, #tpu.memory_space<vmem>>, vector<1x96xf32>
    %210 = vector.broadcast %209 : vector<1x96xf32> to vector<8x96xf32>
    %211 = arith.addf %208, %210 : vector<8x96xf32>
    %212 = vector.extract_strided_slice %206 {offsets = [0, 0], sizes = [8, 32], strides = [1, 1]} : vector<8x96xf32> to vector<8x32xf32>
    %213 = vector.extract_strided_slice %211 {offsets = [0, 0], sizes = [8, 32], strides = [1, 1]} : vector<8x96xf32> to vector<8x32xf32>
    %214 = arith.addf %212, %213 : vector<8x32xf32>
    %215 = arith.negf %214 : vector<8x32xf32>
    %216 = math.exp %215 : vector<8x32xf32>
    %cst_81 = arith.constant 1.000000e+00 : f32
    %217 = vector.broadcast %cst_81 : f32 to vector<8x32xf32>
    %218 = arith.addf %217, %216 : vector<8x32xf32>
    %219 = arith.divf %217, %218 : vector<8x32xf32>
    %220 = vector.extract_strided_slice %206 {offsets = [0, 32], sizes = [8, 32], strides = [1, 1]} : vector<8x96xf32> to vector<8x32xf32>
    %221 = vector.extract_strided_slice %211 {offsets = [0, 32], sizes = [8, 32], strides = [1, 1]} : vector<8x96xf32> to vector<8x32xf32>
    %222 = arith.addf %220, %221 : vector<8x32xf32>
    %223 = arith.negf %222 : vector<8x32xf32>
    %224 = math.exp %223 : vector<8x32xf32>
    %cst_82 = arith.constant 1.000000e+00 : f32
    %225 = vector.broadcast %cst_82 : f32 to vector<8x32xf32>
    %226 = arith.addf %225, %224 : vector<8x32xf32>
    %227 = arith.divf %225, %226 : vector<8x32xf32>
    %228 = vector.extract_strided_slice %206 {offsets = [0, 64], sizes = [8, 32], strides = [1, 1]} : vector<8x96xf32> to vector<8x32xf32>
    %229 = vector.extract_strided_slice %211 {offsets = [0, 64], sizes = [8, 32], strides = [1, 1]} : vector<8x96xf32> to vector<8x32xf32>
    %230 = arith.mulf %219, %229 : vector<8x32xf32>
    %231 = arith.addf %228, %230 : vector<8x32xf32>
    %232 = math.tanh %231 : vector<8x32xf32>
    %cst_83 = arith.constant 1.000000e+00 : f32
    %233 = vector.broadcast %cst_83 : f32 to vector<8x32xf32>
    %234 = arith.subf %233, %227 : vector<8x32xf32>
    %235 = arith.mulf %234, %232 : vector<8x32xf32>
    %236 = arith.mulf %227, %204 : vector<8x32xf32>
    %237 = arith.addf %235, %236 : vector<8x32xf32>
    %c48_84 = arith.constant 48 : index
    %c0_85 = arith.constant 0 : index
    %238 = vector.load %arg13[%c48_84, %c0_85] : memref<64x32xf32, #tpu.memory_space<vmem>>, vector<8x32xf32>
    tpu.vector_store %arg13[%c48_84, %c0_85], %237 {strides = array<i32>} : memref<64x32xf32, #tpu.memory_space<vmem>>, vector<8x32xf32>,
    %c56 = arith.constant 56 : index
    %c0_86 = arith.constant 0 : index
    %239 = vector.load %arg12[%c56, %c0_86] : memref<64x96xf32, #tpu.memory_space<vmem>>, vector<8x96xf32>
    %c0_87 = arith.constant 0 : index
    %c0_88 = arith.constant 0 : index
    %240 = vector.load %arg3[%c0_87, %c0_88] : memref<32x96xf32, #tpu.memory_space<vmem>>, vector<32x96xf32>
    %cst_89 = arith.constant dense<0.000000e+00> : vector<8x96xf32>
    %241 = tpu.matmul %237, %240, %cst_89 {dimension_numbers = #tpu.dot_dimension_numbers<[1], [0], [0], [1], [0, 0, 1, 1], [], []>} : vector<8x32xf32>, vector<32x96xf32>, vector<8x96xf32> -> vector<8x96xf32>
    %c0_90 = arith.constant 0 : index
    %c0_91 = arith.constant 0 : index
    %242 = vector.load %arg4[%c0_90, %c0_91] : memref<1x96xf32, #tpu.memory_space<vmem>>, vector<1x96xf32>
    %243 = vector.broadcast %242 : vector<1x96xf32> to vector<8x96xf32>
    %244 = arith.addf %241, %243 : vector<8x96xf32>
    %245 = vector.extract_strided_slice %239 {offsets = [0, 0], sizes = [8, 32], strides = [1, 1]} : vector<8x96xf32> to vector<8x32xf32>
    %246 = vector.extract_strided_slice %244 {offsets = [0, 0], sizes = [8, 32], strides = [1, 1]} : vector<8x96xf32> to vector<8x32xf32>
    %247 = arith.addf %245, %246 : vector<8x32xf32>
    %248 = arith.negf %247 : vector<8x32xf32>
    %249 = math.exp %248 : vector<8x32xf32>
    %cst_92 = arith.constant 1.000000e+00 : f32
    %250 = vector.broadcast %cst_92 : f32 to vector<8x32xf32>
    %251 = arith.addf %250, %249 : vector<8x32xf32>
    %252 = arith.divf %250, %251 : vector<8x32xf32>
    %253 = vector.extract_strided_slice %239 {offsets = [0, 32], sizes = [8, 32], strides = [1, 1]} : vector<8x96xf32> to vector<8x32xf32>
    %254 = vector.extract_strided_slice %244 {offsets = [0, 32], sizes = [8, 32], strides = [1, 1]} : vector<8x96xf32> to vector<8x32xf32>
    %255 = arith.addf %253, %254 : vector<8x32xf32>
    %256 = arith.negf %255 : vector<8x32xf32>
    %257 = math.exp %256 : vector<8x32xf32>
    %cst_93 = arith.constant 1.000000e+00 : f32
    %258 = vector.broadcast %cst_93 : f32 to vector<8x32xf32>
    %259 = arith.addf %258, %257 : vector<8x32xf32>
    %260 = arith.divf %258, %259 : vector<8x32xf32>
    %261 = vector.extract_strided_slice %239 {offsets = [0, 64], sizes = [8, 32], strides = [1, 1]} : vector<8x96xf32> to vector<8x32xf32>
    %262 = vector.extract_strided_slice %244 {offsets = [0, 64], sizes = [8, 32], strides = [1, 1]} : vector<8x96xf32> to vector<8x32xf32>
    %263 = arith.mulf %252, %262 : vector<8x32xf32>
    %264 = arith.addf %261, %263 : vector<8x32xf32>
    %265 = math.tanh %264 : vector<8x32xf32>
    %cst_94 = arith.constant 1.000000e+00 : f32
    %266 = vector.broadcast %cst_94 : f32 to vector<8x32xf32>
    %267 = arith.subf %266, %260 : vector<8x32xf32>
    %268 = arith.mulf %267, %265 : vector<8x32xf32>
    %269 = arith.mulf %260, %237 : vector<8x32xf32>
    %270 = arith.addf %268, %269 : vector<8x32xf32>
    %c56_95 = arith.constant 56 : index
    %c0_96 = arith.constant 0 : index
    %271 = vector.load %arg13[%c56_95, %c0_96] : memref<64x32xf32, #tpu.memory_space<vmem>>, vector<8x32xf32>
    tpu.vector_store %arg13[%c56_95, %c0_96], %270 {strides = array<i32>} : memref<64x32xf32, #tpu.memory_space<vmem>>, vector<8x32xf32>,
    %c0_97 = arith.constant 0 : index
    %c0_98 = arith.constant 0 : index
    %272 = vector.load %arg13[%c0_97, %c0_98] : memref<64x32xf32, #tpu.memory_space<vmem>>, vector<64x32xf32>
    %c0_99 = arith.constant 0 : index
    %c0_100 = arith.constant 0 : index
    %273 = vector.load %arg5[%c0_99, %c0_100] : memref<32x96xf32, #tpu.memory_space<vmem>>, vector<32x96xf32>
    %cst_101 = arith.constant dense<0.000000e+00> : vector<64x96xf32>
    %274 = tpu.matmul %272, %273, %cst_101 {dimension_numbers = #tpu.dot_dimension_numbers<[1], [0], [0], [1], [0, 0, 1, 1], [], []>} : vector<64x32xf32>, vector<32x96xf32>, vector<64x96xf32> -> vector<64x96xf32>
    %c0_102 = arith.constant 0 : index
    %c0_103 = arith.constant 0 : index
    %275 = vector.load %arg6[%c0_102, %c0_103] : memref<1x96xf32, #tpu.memory_space<vmem>>, vector<1x96xf32>
    %276 = vector.broadcast %275 : vector<1x96xf32> to vector<64x96xf32>
    %277 = arith.addf %274, %276 : vector<64x96xf32>
    %c0_104 = arith.constant 0 : index
    %c0_105 = arith.constant 0 : index
    %278 = vector.load %arg12[%c0_104, %c0_105] : memref<64x96xf32, #tpu.memory_space<vmem>>, vector<64x96xf32>
    tpu.vector_store %arg12[%c0_104, %c0_105], %277 {strides = array<i32>} : memref<64x96xf32, #tpu.memory_space<vmem>>, vector<64x96xf32>,
    %cst_106 = arith.constant 0.000000e+00 : f32
    %279 = vector.broadcast %cst_106 : f32 to vector<8x32xf32>
    %c0_107 = arith.constant 0 : index
    %c0_108 = arith.constant 0 : index
    %280 = vector.load %arg12[%c0_107, %c0_108] : memref<64x96xf32, #tpu.memory_space<vmem>>, vector<8x96xf32>
    %c0_109 = arith.constant 0 : index
    %c0_110 = arith.constant 0 : index
    %281 = vector.load %arg7[%c0_109, %c0_110] : memref<32x96xf32, #tpu.memory_space<vmem>>, vector<32x96xf32>
    %cst_111 = arith.constant dense<0.000000e+00> : vector<8x96xf32>
    %282 = tpu.matmul %279, %281, %cst_111 {dimension_numbers = #tpu.dot_dimension_numbers<[1], [0], [0], [1], [0, 0, 1, 1], [], []>} : vector<8x32xf32>, vector<32x96xf32>, vector<8x96xf32> -> vector<8x96xf32>
    %c0_112 = arith.constant 0 : index
    %c0_113 = arith.constant 0 : index
    %283 = vector.load %arg8[%c0_112, %c0_113] : memref<1x96xf32, #tpu.memory_space<vmem>>, vector<1x96xf32>
    %284 = vector.broadcast %283 : vector<1x96xf32> to vector<8x96xf32>
    %285 = arith.addf %282, %284 : vector<8x96xf32>
    %286 = vector.extract_strided_slice %280 {offsets = [0, 0], sizes = [8, 32], strides = [1, 1]} : vector<8x96xf32> to vector<8x32xf32>
    %287 = vector.extract_strided_slice %285 {offsets = [0, 0], sizes = [8, 32], strides = [1, 1]} : vector<8x96xf32> to vector<8x32xf32>
    %288 = arith.addf %286, %287 : vector<8x32xf32>
    %289 = arith.negf %288 : vector<8x32xf32>
    %290 = math.exp %289 : vector<8x32xf32>
    %cst_114 = arith.constant 1.000000e+00 : f32
    %291 = vector.broadcast %cst_114 : f32 to vector<8x32xf32>
    %292 = arith.addf %291, %290 : vector<8x32xf32>
    %293 = arith.divf %291, %292 : vector<8x32xf32>
    %294 = vector.extract_strided_slice %280 {offsets = [0, 32], sizes = [8, 32], strides = [1, 1]} : vector<8x96xf32> to vector<8x32xf32>
    %295 = vector.extract_strided_slice %285 {offsets = [0, 32], sizes = [8, 32], strides = [1, 1]} : vector<8x96xf32> to vector<8x32xf32>
    %296 = arith.addf %294, %295 : vector<8x32xf32>
    %297 = arith.negf %296 : vector<8x32xf32>
    %298 = math.exp %297 : vector<8x32xf32>
    %cst_115 = arith.constant 1.000000e+00 : f32
    %299 = vector.broadcast %cst_115 : f32 to vector<8x32xf32>
    %300 = arith.addf %299, %298 : vector<8x32xf32>
    %301 = arith.divf %299, %300 : vector<8x32xf32>
    %302 = vector.extract_strided_slice %280 {offsets = [0, 64], sizes = [8, 32], strides = [1, 1]} : vector<8x96xf32> to vector<8x32xf32>
    %303 = vector.extract_strided_slice %285 {offsets = [0, 64], sizes = [8, 32], strides = [1, 1]} : vector<8x96xf32> to vector<8x32xf32>
    %304 = arith.mulf %293, %303 : vector<8x32xf32>
    %305 = arith.addf %302, %304 : vector<8x32xf32>
    %306 = math.tanh %305 : vector<8x32xf32>
    %cst_116 = arith.constant 1.000000e+00 : f32
    %307 = vector.broadcast %cst_116 : f32 to vector<8x32xf32>
    %308 = arith.subf %307, %301 : vector<8x32xf32>
    %309 = arith.mulf %308, %306 : vector<8x32xf32>
    %310 = arith.mulf %301, %279 : vector<8x32xf32>
    %311 = arith.addf %309, %310 : vector<8x32xf32>
    %c8_117 = arith.constant 8 : index
    %c0_118 = arith.constant 0 : index
    %312 = vector.load %arg12[%c8_117, %c0_118] : memref<64x96xf32, #tpu.memory_space<vmem>>, vector<8x96xf32>
    %c0_119 = arith.constant 0 : index
    %c0_120 = arith.constant 0 : index
    %313 = vector.load %arg7[%c0_119, %c0_120] : memref<32x96xf32, #tpu.memory_space<vmem>>, vector<32x96xf32>
    %cst_121 = arith.constant dense<0.000000e+00> : vector<8x96xf32>
    %314 = tpu.matmul %311, %313, %cst_121 {dimension_numbers = #tpu.dot_dimension_numbers<[1], [0], [0], [1], [0, 0, 1, 1], [], []>} : vector<8x32xf32>, vector<32x96xf32>, vector<8x96xf32> -> vector<8x96xf32>
    %c0_122 = arith.constant 0 : index
    %c0_123 = arith.constant 0 : index
    %315 = vector.load %arg8[%c0_122, %c0_123] : memref<1x96xf32, #tpu.memory_space<vmem>>, vector<1x96xf32>
    %316 = vector.broadcast %315 : vector<1x96xf32> to vector<8x96xf32>
    %317 = arith.addf %314, %316 : vector<8x96xf32>
    %318 = vector.extract_strided_slice %312 {offsets = [0, 0], sizes = [8, 32], strides = [1, 1]} : vector<8x96xf32> to vector<8x32xf32>
    %319 = vector.extract_strided_slice %317 {offsets = [0, 0], sizes = [8, 32], strides = [1, 1]} : vector<8x96xf32> to vector<8x32xf32>
    %320 = arith.addf %318, %319 : vector<8x32xf32>
    %321 = arith.negf %320 : vector<8x32xf32>
    %322 = math.exp %321 : vector<8x32xf32>
    %cst_124 = arith.constant 1.000000e+00 : f32
    %323 = vector.broadcast %cst_124 : f32 to vector<8x32xf32>
    %324 = arith.addf %323, %322 : vector<8x32xf32>
    %325 = arith.divf %323, %324 : vector<8x32xf32>
    %326 = vector.extract_strided_slice %312 {offsets = [0, 32], sizes = [8, 32], strides = [1, 1]} : vector<8x96xf32> to vector<8x32xf32>
    %327 = vector.extract_strided_slice %317 {offsets = [0, 32], sizes = [8, 32], strides = [1, 1]} : vector<8x96xf32> to vector<8x32xf32>
    %328 = arith.addf %326, %327 : vector<8x32xf32>
    %329 = arith.negf %328 : vector<8x32xf32>
    %330 = math.exp %329 : vector<8x32xf32>
    %cst_125 = arith.constant 1.000000e+00 : f32
    %331 = vector.broadcast %cst_125 : f32 to vector<8x32xf32>
    %332 = arith.addf %331, %330 : vector<8x32xf32>
    %333 = arith.divf %331, %332 : vector<8x32xf32>
    %334 = vector.extract_strided_slice %312 {offsets = [0, 64], sizes = [8, 32], strides = [1, 1]} : vector<8x96xf32> to vector<8x32xf32>
    %335 = vector.extract_strided_slice %317 {offsets = [0, 64], sizes = [8, 32], strides = [1, 1]} : vector<8x96xf32> to vector<8x32xf32>
    %336 = arith.mulf %325, %335 : vector<8x32xf32>
    %337 = arith.addf %334, %336 : vector<8x32xf32>
    %338 = math.tanh %337 : vector<8x32xf32>
    %cst_126 = arith.constant 1.000000e+00 : f32
    %339 = vector.broadcast %cst_126 : f32 to vector<8x32xf32>
    %340 = arith.subf %339, %333 : vector<8x32xf32>
    %341 = arith.mulf %340, %338 : vector<8x32xf32>
    %342 = arith.mulf %333, %311 : vector<8x32xf32>
    %343 = arith.addf %341, %342 : vector<8x32xf32>
    %c16_127 = arith.constant 16 : index
    %c0_128 = arith.constant 0 : index
    %344 = vector.load %arg12[%c16_127, %c0_128] : memref<64x96xf32, #tpu.memory_space<vmem>>, vector<8x96xf32>
    %c0_129 = arith.constant 0 : index
    %c0_130 = arith.constant 0 : index
    %345 = vector.load %arg7[%c0_129, %c0_130] : memref<32x96xf32, #tpu.memory_space<vmem>>, vector<32x96xf32>
    %cst_131 = arith.constant dense<0.000000e+00> : vector<8x96xf32>
    %346 = tpu.matmul %343, %345, %cst_131 {dimension_numbers = #tpu.dot_dimension_numbers<[1], [0], [0], [1], [0, 0, 1, 1], [], []>} : vector<8x32xf32>, vector<32x96xf32>, vector<8x96xf32> -> vector<8x96xf32>
    %c0_132 = arith.constant 0 : index
    %c0_133 = arith.constant 0 : index
    %347 = vector.load %arg8[%c0_132, %c0_133] : memref<1x96xf32, #tpu.memory_space<vmem>>, vector<1x96xf32>
    %348 = vector.broadcast %347 : vector<1x96xf32> to vector<8x96xf32>
    %349 = arith.addf %346, %348 : vector<8x96xf32>
    %350 = vector.extract_strided_slice %344 {offsets = [0, 0], sizes = [8, 32], strides = [1, 1]} : vector<8x96xf32> to vector<8x32xf32>
    %351 = vector.extract_strided_slice %349 {offsets = [0, 0], sizes = [8, 32], strides = [1, 1]} : vector<8x96xf32> to vector<8x32xf32>
    %352 = arith.addf %350, %351 : vector<8x32xf32>
    %353 = arith.negf %352 : vector<8x32xf32>
    %354 = math.exp %353 : vector<8x32xf32>
    %cst_134 = arith.constant 1.000000e+00 : f32
    %355 = vector.broadcast %cst_134 : f32 to vector<8x32xf32>
    %356 = arith.addf %355, %354 : vector<8x32xf32>
    %357 = arith.divf %355, %356 : vector<8x32xf32>
    %358 = vector.extract_strided_slice %344 {offsets = [0, 32], sizes = [8, 32], strides = [1, 1]} : vector<8x96xf32> to vector<8x32xf32>
    %359 = vector.extract_strided_slice %349 {offsets = [0, 32], sizes = [8, 32], strides = [1, 1]} : vector<8x96xf32> to vector<8x32xf32>
    %360 = arith.addf %358, %359 : vector<8x32xf32>
    %361 = arith.negf %360 : vector<8x32xf32>
    %362 = math.exp %361 : vector<8x32xf32>
    %cst_135 = arith.constant 1.000000e+00 : f32
    %363 = vector.broadcast %cst_135 : f32 to vector<8x32xf32>
    %364 = arith.addf %363, %362 : vector<8x32xf32>
    %365 = arith.divf %363, %364 : vector<8x32xf32>
    %366 = vector.extract_strided_slice %344 {offsets = [0, 64], sizes = [8, 32], strides = [1, 1]} : vector<8x96xf32> to vector<8x32xf32>
    %367 = vector.extract_strided_slice %349 {offsets = [0, 64], sizes = [8, 32], strides = [1, 1]} : vector<8x96xf32> to vector<8x32xf32>
    %368 = arith.mulf %357, %367 : vector<8x32xf32>
    %369 = arith.addf %366, %368 : vector<8x32xf32>
    %370 = math.tanh %369 : vector<8x32xf32>
    %cst_136 = arith.constant 1.000000e+00 : f32
    %371 = vector.broadcast %cst_136 : f32 to vector<8x32xf32>
    %372 = arith.subf %371, %365 : vector<8x32xf32>
    %373 = arith.mulf %372, %370 : vector<8x32xf32>
    %374 = arith.mulf %365, %343 : vector<8x32xf32>
    %375 = arith.addf %373, %374 : vector<8x32xf32>
    %c24_137 = arith.constant 24 : index
    %c0_138 = arith.constant 0 : index
    %376 = vector.load %arg12[%c24_137, %c0_138] : memref<64x96xf32, #tpu.memory_space<vmem>>, vector<8x96xf32>
    %c0_139 = arith.constant 0 : index
    %c0_140 = arith.constant 0 : index
    %377 = vector.load %arg7[%c0_139, %c0_140] : memref<32x96xf32, #tpu.memory_space<vmem>>, vector<32x96xf32>
    %cst_141 = arith.constant dense<0.000000e+00> : vector<8x96xf32>
    %378 = tpu.matmul %375, %377, %cst_141 {dimension_numbers = #tpu.dot_dimension_numbers<[1], [0], [0], [1], [0, 0, 1, 1], [], []>} : vector<8x32xf32>, vector<32x96xf32>, vector<8x96xf32> -> vector<8x96xf32>
    %c0_142 = arith.constant 0 : index
    %c0_143 = arith.constant 0 : index
    %379 = vector.load %arg8[%c0_142, %c0_143] : memref<1x96xf32, #tpu.memory_space<vmem>>, vector<1x96xf32>
    %380 = vector.broadcast %379 : vector<1x96xf32> to vector<8x96xf32>
    %381 = arith.addf %378, %380 : vector<8x96xf32>
    %382 = vector.extract_strided_slice %376 {offsets = [0, 0], sizes = [8, 32], strides = [1, 1]} : vector<8x96xf32> to vector<8x32xf32>
    %383 = vector.extract_strided_slice %381 {offsets = [0, 0], sizes = [8, 32], strides = [1, 1]} : vector<8x96xf32> to vector<8x32xf32>
    %384 = arith.addf %382, %383 : vector<8x32xf32>
    %385 = arith.negf %384 : vector<8x32xf32>
    %386 = math.exp %385 : vector<8x32xf32>
    %cst_144 = arith.constant 1.000000e+00 : f32
    %387 = vector.broadcast %cst_144 : f32 to vector<8x32xf32>
    %388 = arith.addf %387, %386 : vector<8x32xf32>
    %389 = arith.divf %387, %388 : vector<8x32xf32>
    %390 = vector.extract_strided_slice %376 {offsets = [0, 32], sizes = [8, 32], strides = [1, 1]} : vector<8x96xf32> to vector<8x32xf32>
    %391 = vector.extract_strided_slice %381 {offsets = [0, 32], sizes = [8, 32], strides = [1, 1]} : vector<8x96xf32> to vector<8x32xf32>
    %392 = arith.addf %390, %391 : vector<8x32xf32>
    %393 = arith.negf %392 : vector<8x32xf32>
    %394 = math.exp %393 : vector<8x32xf32>
    %cst_145 = arith.constant 1.000000e+00 : f32
    %395 = vector.broadcast %cst_145 : f32 to vector<8x32xf32>
    %396 = arith.addf %395, %394 : vector<8x32xf32>
    %397 = arith.divf %395, %396 : vector<8x32xf32>
    %398 = vector.extract_strided_slice %376 {offsets = [0, 64], sizes = [8, 32], strides = [1, 1]} : vector<8x96xf32> to vector<8x32xf32>
    %399 = vector.extract_strided_slice %381 {offsets = [0, 64], sizes = [8, 32], strides = [1, 1]} : vector<8x96xf32> to vector<8x32xf32>
    %400 = arith.mulf %389, %399 : vector<8x32xf32>
    %401 = arith.addf %398, %400 : vector<8x32xf32>
    %402 = math.tanh %401 : vector<8x32xf32>
    %cst_146 = arith.constant 1.000000e+00 : f32
    %403 = vector.broadcast %cst_146 : f32 to vector<8x32xf32>
    %404 = arith.subf %403, %397 : vector<8x32xf32>
    %405 = arith.mulf %404, %402 : vector<8x32xf32>
    %406 = arith.mulf %397, %375 : vector<8x32xf32>
    %407 = arith.addf %405, %406 : vector<8x32xf32>
    %c32_147 = arith.constant 32 : index
    %c0_148 = arith.constant 0 : index
    %408 = vector.load %arg12[%c32_147, %c0_148] : memref<64x96xf32, #tpu.memory_space<vmem>>, vector<8x96xf32>
    %c0_149 = arith.constant 0 : index
    %c0_150 = arith.constant 0 : index
    %409 = vector.load %arg7[%c0_149, %c0_150] : memref<32x96xf32, #tpu.memory_space<vmem>>, vector<32x96xf32>
    %cst_151 = arith.constant dense<0.000000e+00> : vector<8x96xf32>
    %410 = tpu.matmul %407, %409, %cst_151 {dimension_numbers = #tpu.dot_dimension_numbers<[1], [0], [0], [1], [0, 0, 1, 1], [], []>} : vector<8x32xf32>, vector<32x96xf32>, vector<8x96xf32> -> vector<8x96xf32>
    %c0_152 = arith.constant 0 : index
    %c0_153 = arith.constant 0 : index
    %411 = vector.load %arg8[%c0_152, %c0_153] : memref<1x96xf32, #tpu.memory_space<vmem>>, vector<1x96xf32>
    %412 = vector.broadcast %411 : vector<1x96xf32> to vector<8x96xf32>
    %413 = arith.addf %410, %412 : vector<8x96xf32>
    %414 = vector.extract_strided_slice %408 {offsets = [0, 0], sizes = [8, 32], strides = [1, 1]} : vector<8x96xf32> to vector<8x32xf32>
    %415 = vector.extract_strided_slice %413 {offsets = [0, 0], sizes = [8, 32], strides = [1, 1]} : vector<8x96xf32> to vector<8x32xf32>
    %416 = arith.addf %414, %415 : vector<8x32xf32>
    %417 = arith.negf %416 : vector<8x32xf32>
    %418 = math.exp %417 : vector<8x32xf32>
    %cst_154 = arith.constant 1.000000e+00 : f32
    %419 = vector.broadcast %cst_154 : f32 to vector<8x32xf32>
    %420 = arith.addf %419, %418 : vector<8x32xf32>
    %421 = arith.divf %419, %420 : vector<8x32xf32>
    %422 = vector.extract_strided_slice %408 {offsets = [0, 32], sizes = [8, 32], strides = [1, 1]} : vector<8x96xf32> to vector<8x32xf32>
    %423 = vector.extract_strided_slice %413 {offsets = [0, 32], sizes = [8, 32], strides = [1, 1]} : vector<8x96xf32> to vector<8x32xf32>
    %424 = arith.addf %422, %423 : vector<8x32xf32>
    %425 = arith.negf %424 : vector<8x32xf32>
    %426 = math.exp %425 : vector<8x32xf32>
    %cst_155 = arith.constant 1.000000e+00 : f32
    %427 = vector.broadcast %cst_155 : f32 to vector<8x32xf32>
    %428 = arith.addf %427, %426 : vector<8x32xf32>
    %429 = arith.divf %427, %428 : vector<8x32xf32>
    %430 = vector.extract_strided_slice %408 {offsets = [0, 64], sizes = [8, 32], strides = [1, 1]} : vector<8x96xf32> to vector<8x32xf32>
    %431 = vector.extract_strided_slice %413 {offsets = [0, 64], sizes = [8, 32], strides = [1, 1]} : vector<8x96xf32> to vector<8x32xf32>
    %432 = arith.mulf %421, %431 : vector<8x32xf32>
    %433 = arith.addf %430, %432 : vector<8x32xf32>
    %434 = math.tanh %433 : vector<8x32xf32>
    %cst_156 = arith.constant 1.000000e+00 : f32
    %435 = vector.broadcast %cst_156 : f32 to vector<8x32xf32>
    %436 = arith.subf %435, %429 : vector<8x32xf32>
    %437 = arith.mulf %436, %434 : vector<8x32xf32>
    %438 = arith.mulf %429, %407 : vector<8x32xf32>
    %439 = arith.addf %437, %438 : vector<8x32xf32>
    %c40_157 = arith.constant 40 : index
    %c0_158 = arith.constant 0 : index
    %440 = vector.load %arg12[%c40_157, %c0_158] : memref<64x96xf32, #tpu.memory_space<vmem>>, vector<8x96xf32>
    %c0_159 = arith.constant 0 : index
    %c0_160 = arith.constant 0 : index
    %441 = vector.load %arg7[%c0_159, %c0_160] : memref<32x96xf32, #tpu.memory_space<vmem>>, vector<32x96xf32>
    %cst_161 = arith.constant dense<0.000000e+00> : vector<8x96xf32>
    %442 = tpu.matmul %439, %441, %cst_161 {dimension_numbers = #tpu.dot_dimension_numbers<[1], [0], [0], [1], [0, 0, 1, 1], [], []>} : vector<8x32xf32>, vector<32x96xf32>, vector<8x96xf32> -> vector<8x96xf32>
    %c0_162 = arith.constant 0 : index
    %c0_163 = arith.constant 0 : index
    %443 = vector.load %arg8[%c0_162, %c0_163] : memref<1x96xf32, #tpu.memory_space<vmem>>, vector<1x96xf32>
    %444 = vector.broadcast %443 : vector<1x96xf32> to vector<8x96xf32>
    %445 = arith.addf %442, %444 : vector<8x96xf32>
    %446 = vector.extract_strided_slice %440 {offsets = [0, 0], sizes = [8, 32], strides = [1, 1]} : vector<8x96xf32> to vector<8x32xf32>
    %447 = vector.extract_strided_slice %445 {offsets = [0, 0], sizes = [8, 32], strides = [1, 1]} : vector<8x96xf32> to vector<8x32xf32>
    %448 = arith.addf %446, %447 : vector<8x32xf32>
    %449 = arith.negf %448 : vector<8x32xf32>
    %450 = math.exp %449 : vector<8x32xf32>
    %cst_164 = arith.constant 1.000000e+00 : f32
    %451 = vector.broadcast %cst_164 : f32 to vector<8x32xf32>
    %452 = arith.addf %451, %450 : vector<8x32xf32>
    %453 = arith.divf %451, %452 : vector<8x32xf32>
    %454 = vector.extract_strided_slice %440 {offsets = [0, 32], sizes = [8, 32], strides = [1, 1]} : vector<8x96xf32> to vector<8x32xf32>
    %455 = vector.extract_strided_slice %445 {offsets = [0, 32], sizes = [8, 32], strides = [1, 1]} : vector<8x96xf32> to vector<8x32xf32>
    %456 = arith.addf %454, %455 : vector<8x32xf32>
    %457 = arith.negf %456 : vector<8x32xf32>
    %458 = math.exp %457 : vector<8x32xf32>
    %cst_165 = arith.constant 1.000000e+00 : f32
    %459 = vector.broadcast %cst_165 : f32 to vector<8x32xf32>
    %460 = arith.addf %459, %458 : vector<8x32xf32>
    %461 = arith.divf %459, %460 : vector<8x32xf32>
    %462 = vector.extract_strided_slice %440 {offsets = [0, 64], sizes = [8, 32], strides = [1, 1]} : vector<8x96xf32> to vector<8x32xf32>
    %463 = vector.extract_strided_slice %445 {offsets = [0, 64], sizes = [8, 32], strides = [1, 1]} : vector<8x96xf32> to vector<8x32xf32>
    %464 = arith.mulf %453, %463 : vector<8x32xf32>
    %465 = arith.addf %462, %464 : vector<8x32xf32>
    %466 = math.tanh %465 : vector<8x32xf32>
    %cst_166 = arith.constant 1.000000e+00 : f32
    %467 = vector.broadcast %cst_166 : f32 to vector<8x32xf32>
    %468 = arith.subf %467, %461 : vector<8x32xf32>
    %469 = arith.mulf %468, %466 : vector<8x32xf32>
    %470 = arith.mulf %461, %439 : vector<8x32xf32>
    %471 = arith.addf %469, %470 : vector<8x32xf32>
    %c48_167 = arith.constant 48 : index
    %c0_168 = arith.constant 0 : index
    %472 = vector.load %arg12[%c48_167, %c0_168] : memref<64x96xf32, #tpu.memory_space<vmem>>, vector<8x96xf32>
    %c0_169 = arith.constant 0 : index
    %c0_170 = arith.constant 0 : index
    %473 = vector.load %arg7[%c0_169, %c0_170] : memref<32x96xf32, #tpu.memory_space<vmem>>, vector<32x96xf32>
    %cst_171 = arith.constant dense<0.000000e+00> : vector<8x96xf32>
    %474 = tpu.matmul %471, %473, %cst_171 {dimension_numbers = #tpu.dot_dimension_numbers<[1], [0], [0], [1], [0, 0, 1, 1], [], []>} : vector<8x32xf32>, vector<32x96xf32>, vector<8x96xf32> -> vector<8x96xf32>
    %c0_172 = arith.constant 0 : index
    %c0_173 = arith.constant 0 : index
    %475 = vector.load %arg8[%c0_172, %c0_173] : memref<1x96xf32, #tpu.memory_space<vmem>>, vector<1x96xf32>
    %476 = vector.broadcast %475 : vector<1x96xf32> to vector<8x96xf32>
    %477 = arith.addf %474, %476 : vector<8x96xf32>
    %478 = vector.extract_strided_slice %472 {offsets = [0, 0], sizes = [8, 32], strides = [1, 1]} : vector<8x96xf32> to vector<8x32xf32>
    %479 = vector.extract_strided_slice %477 {offsets = [0, 0], sizes = [8, 32], strides = [1, 1]} : vector<8x96xf32> to vector<8x32xf32>
    %480 = arith.addf %478, %479 : vector<8x32xf32>
    %481 = arith.negf %480 : vector<8x32xf32>
    %482 = math.exp %481 : vector<8x32xf32>
    %cst_174 = arith.constant 1.000000e+00 : f32
    %483 = vector.broadcast %cst_174 : f32 to vector<8x32xf32>
    %484 = arith.addf %483, %482 : vector<8x32xf32>
    %485 = arith.divf %483, %484 : vector<8x32xf32>
    %486 = vector.extract_strided_slice %472 {offsets = [0, 32], sizes = [8, 32], strides = [1, 1]} : vector<8x96xf32> to vector<8x32xf32>
    %487 = vector.extract_strided_slice %477 {offsets = [0, 32], sizes = [8, 32], strides = [1, 1]} : vector<8x96xf32> to vector<8x32xf32>
    %488 = arith.addf %486, %487 : vector<8x32xf32>
    %489 = arith.negf %488 : vector<8x32xf32>
    %490 = math.exp %489 : vector<8x32xf32>
    %cst_175 = arith.constant 1.000000e+00 : f32
    %491 = vector.broadcast %cst_175 : f32 to vector<8x32xf32>
    %492 = arith.addf %491, %490 : vector<8x32xf32>
    %493 = arith.divf %491, %492 : vector<8x32xf32>
    %494 = vector.extract_strided_slice %472 {offsets = [0, 64], sizes = [8, 32], strides = [1, 1]} : vector<8x96xf32> to vector<8x32xf32>
    %495 = vector.extract_strided_slice %477 {offsets = [0, 64], sizes = [8, 32], strides = [1, 1]} : vector<8x96xf32> to vector<8x32xf32>
    %496 = arith.mulf %485, %495 : vector<8x32xf32>
    %497 = arith.addf %494, %496 : vector<8x32xf32>
    %498 = math.tanh %497 : vector<8x32xf32>
    %cst_176 = arith.constant 1.000000e+00 : f32
    %499 = vector.broadcast %cst_176 : f32 to vector<8x32xf32>
    %500 = arith.subf %499, %493 : vector<8x32xf32>
    %501 = arith.mulf %500, %498 : vector<8x32xf32>
    %502 = arith.mulf %493, %471 : vector<8x32xf32>
    %503 = arith.addf %501, %502 : vector<8x32xf32>
    %c56_177 = arith.constant 56 : index
    %c0_178 = arith.constant 0 : index
    %504 = vector.load %arg12[%c56_177, %c0_178] : memref<64x96xf32, #tpu.memory_space<vmem>>, vector<8x96xf32>
    %c0_179 = arith.constant 0 : index
    %c0_180 = arith.constant 0 : index
    %505 = vector.load %arg7[%c0_179, %c0_180] : memref<32x96xf32, #tpu.memory_space<vmem>>, vector<32x96xf32>
    %cst_181 = arith.constant dense<0.000000e+00> : vector<8x96xf32>
    %506 = tpu.matmul %503, %505, %cst_181 {dimension_numbers = #tpu.dot_dimension_numbers<[1], [0], [0], [1], [0, 0, 1, 1], [], []>} : vector<8x32xf32>, vector<32x96xf32>, vector<8x96xf32> -> vector<8x96xf32>
    %c0_182 = arith.constant 0 : index
    %c0_183 = arith.constant 0 : index
    %507 = vector.load %arg8[%c0_182, %c0_183] : memref<1x96xf32, #tpu.memory_space<vmem>>, vector<1x96xf32>
    %508 = vector.broadcast %507 : vector<1x96xf32> to vector<8x96xf32>
    %509 = arith.addf %506, %508 : vector<8x96xf32>
    %510 = vector.extract_strided_slice %504 {offsets = [0, 0], sizes = [8, 32], strides = [1, 1]} : vector<8x96xf32> to vector<8x32xf32>
    %511 = vector.extract_strided_slice %509 {offsets = [0, 0], sizes = [8, 32], strides = [1, 1]} : vector<8x96xf32> to vector<8x32xf32>
    %512 = arith.addf %510, %511 : vector<8x32xf32>
    %513 = arith.negf %512 : vector<8x32xf32>
    %514 = math.exp %513 : vector<8x32xf32>
    %cst_184 = arith.constant 1.000000e+00 : f32
    %515 = vector.broadcast %cst_184 : f32 to vector<8x32xf32>
    %516 = arith.addf %515, %514 : vector<8x32xf32>
    %517 = arith.divf %515, %516 : vector<8x32xf32>
    %518 = vector.extract_strided_slice %504 {offsets = [0, 32], sizes = [8, 32], strides = [1, 1]} : vector<8x96xf32> to vector<8x32xf32>
    %519 = vector.extract_strided_slice %509 {offsets = [0, 32], sizes = [8, 32], strides = [1, 1]} : vector<8x96xf32> to vector<8x32xf32>
    %520 = arith.addf %518, %519 : vector<8x32xf32>
    %521 = arith.negf %520 : vector<8x32xf32>
    %522 = math.exp %521 : vector<8x32xf32>
    %cst_185 = arith.constant 1.000000e+00 : f32
    %523 = vector.broadcast %cst_185 : f32 to vector<8x32xf32>
    %524 = arith.addf %523, %522 : vector<8x32xf32>
    %525 = arith.divf %523, %524 : vector<8x32xf32>
    %526 = vector.extract_strided_slice %504 {offsets = [0, 64], sizes = [8, 32], strides = [1, 1]} : vector<8x96xf32> to vector<8x32xf32>
    %527 = vector.extract_strided_slice %509 {offsets = [0, 64], sizes = [8, 32], strides = [1, 1]} : vector<8x96xf32> to vector<8x32xf32>
    %528 = arith.mulf %517, %527 : vector<8x32xf32>
    %529 = arith.addf %526, %528 : vector<8x32xf32>
    %530 = math.tanh %529 : vector<8x32xf32>
    %cst_186 = arith.constant 1.000000e+00 : f32
    %531 = vector.broadcast %cst_186 : f32 to vector<8x32xf32>
    %532 = arith.subf %531, %525 : vector<8x32xf32>
    %533 = arith.mulf %532, %530 : vector<8x32xf32>
    %534 = arith.mulf %525, %503 : vector<8x32xf32>
    %535 = arith.addf %533, %534 : vector<8x32xf32>
    %c0_187 = arith.constant 0 : index
    %c0_188 = arith.constant 0 : index
    %536 = vector.load %arg9[%c0_187, %c0_188] : memref<32x4xf32, #tpu.memory_space<vmem>>, vector<32x4xf32>
    %cst_189 = arith.constant dense<0.000000e+00> : vector<8x4xf32>
    %537 = tpu.matmul %535, %536, %cst_189 {dimension_numbers = #tpu.dot_dimension_numbers<[1], [0], [0], [1], [0, 0, 1, 1], [], []>} : vector<8x32xf32>, vector<32x4xf32>, vector<8x4xf32> -> vector<8x4xf32>
    %c0_190 = arith.constant 0 : index
    %c0_191 = arith.constant 0 : index
    %538 = vector.load %arg10[%c0_190, %c0_191] : memref<1x4xf32, #tpu.memory_space<vmem>>, vector<1x4xf32>
    %539 = vector.broadcast %538 : vector<1x4xf32> to vector<8x4xf32>
    %540 = arith.addf %537, %539 : vector<8x4xf32>
    %c0_192 = arith.constant 0 : index
    %c0_193 = arith.constant 0 : index
    %541 = vector.load %arg11[%c0_192, %c0_193] : memref<8x4xf32, #tpu.memory_space<vmem>>, vector<8x4xf32>
    tpu.vector_store %arg11[%c0_192, %c0_193], %540 {strides = array<i32>} : memref<8x4xf32, #tpu.memory_space<vmem>>, vector<8x4xf32>,
    return
  }
}

</mosaic_0001>

<bundles_post_ra>
// kernel: gru_forward.1
= control target key start
LH: loop header
LB: loop body
LE: loop exit
PB: predicated region body
PF: predicated region fallthrough
CT: control target
= control target key end

     0   :  { %vm54_vm0 = vcmask 261120   ;;  %v1539_v9 = vmov 0.0   ;;  %vm120_vm1 = vcmask 785408   ;;  %s1540_s18 = smov 64   ;;  %s1975_s1 = inlined_call_operand.vmem [shape: f32[32,96], index: 1, kind: input, shape index: {}]   ;;  %s1976_s3 = inlined_call_operand.vmem [shape: f32[32,96], index: 3, kind: input, shape index: {}]   ;;  %s1977_s0 = inlined_call_operand.vmem [shape: f32[64,32], index: 0, kind: input, shape index: {}]   ;;  %s1978_s2 = inlined_call_operand.vmem [shape: f32[1,96], index: 2, kind: input, shape index: {}]   ;;  %s1979_s4 = inlined_call_operand.vmem [shape: f32[1,96], index: 4, kind: input, shape index: {}]   ;;  %s1980_s5 = inlined_call_operand.vmem [shape: f32[32,96], index: 5, kind: input, shape index: {}]   ;;  %s1981_s6 = inlined_call_operand.vmem [shape: f32[1,96], index: 6, kind: input, shape index: {}]   ;;  %s1982_s7 = inlined_call_operand.vmem [shape: f32[32,96], index: 7, kind: input, shape index: {}]   ;;  %s1983_s8 = inlined_call_operand.vmem [shape: f32[1,96], index: 8, kind: input, shape index: {}]   ;;  %s1984_s9 = inlined_call_operand.vmem [shape: f32[32,4], index: 9, kind: input, shape index: {}]   ;;  %s1985_s10 = inlined_call_operand.vmem [shape: f32[1,4], index: 10, kind: input, shape index: {}]   ;;  %s1986_s11 = inlined_call_operand.vmem [shape: f32[8,4], index: 11, kind: output, shape index: {}]  }
   0x1   :  { %v49_v0 = vld [vmem:[%s1975_s1 + $0x18] sm:$0xff]  ;;  %v48_v2 = vld [vmem:[%s1975_s1 + $0x10] sm:$0xff]  ;;  %v47_v4 = vld [vmem:[%s1975_s1 + $0x8] sm:$0xff] }
   0x2   :  { %v1608_v1 = vld [vmem:[%s1976_s3 + $0x18] sm:$0xff]  ;;  %91 = vmatpush.msra.mxu0 %v49_v0  ;;  %v1617_v3 = vld [vmem:[%s1976_s3 + $0x10] sm:$0xff]  ;;  %v1625_v5 = vld [vmem:[%s1976_s3 + $0x8] sm:$0xff] }
   0x3   :  { %153 = vmatpush.msra.mxu1 %v1608_v1  ;;  %v46_v6 = vld [vmem:[%s1975_s1] sm:$0xff]  ;;  %228 = vmatpush.msra.mxu2 %v1608_v1  ;;  %v39_v36 = vld [vmem:[%s1977_s0 + $0x8] sm:$0xff] }
   0x4   :  { %528 = vmatpush.msra.mxu3 %v1608_v1  ;;  %92 = vmatpush.msra.mxu0 %v48_v2  ;;  %v1636_v7 = vld [vmem:[%s1976_s3] sm:$0xff] }
   0x5   :  { %154 = vmatpush.msra.mxu1 %v1617_v3  ;;  %v38_v8 = vld [vmem:[%s1977_s0] sm:$0xff]  ;;  %229 = vmatpush.msra.mxu2 %v1617_v3 }
   0x6   :  { %529 = vmatpush.msra.mxu3 %v1617_v3  ;;  %93 = vmatpush.msra.mxu0 %v47_v4  ;;  %v1666_v10 = vld [vmem:[%s1978_s2] ss:$0 sm:$0xff]  ;;  %s1541_s2 = smov 96  }
   0x7   :  { %155 = vmatpush.msra.mxu1 %v1625_v5  ;;  %230 = vmatpush.msra.mxu2 %v1625_v5  ;;  %v1432_v11 = vld [vmem:[%s1979_s4] ss:$0 sm:$0xff] }
   0x8   :  { %530 = vmatpush.msra.mxu3 %v1625_v5  ;;  %94 = vmatpush.msra.mxu0 %v46_v6  ;;  %v1433_v45 = vld [vmem:[%s1979_s4] ss:$0 sm:$0xff] }
   0x9   :  { %156 = vmatpush.msra.mxu1 %v1636_v7  ;;  %1381 = vmatmul.msk.f32.vlgmr.msra.gmra.mxu0 %vm54_vm0, %v38_v8  ;;  %v40_v8 = vld [vmem:[%s1977_s0 + $0x10] sm:$0xff] }
   0xa   :  { %157 = vmatmul.f32.vlgmr.msra.gmra.mxu1 %v1539_v9  ;;  %231 = vmatpush.msra.mxu2 %v1636_v7 }
   0xb   :  { %378 = vmatpush.msrb.mxu1 %v1608_v1  ;;  %531 = vmatpush.msra.mxu3 %v1636_v7 }
   0xc   :  { %303 = vmatpush.msrb.mxu2 %v1608_v1 }
   0xd   :  { %379 = vmatpush.msrb.mxu1 %v1617_v3 }
   0xe   :  { %304 = vmatpush.msrb.mxu2 %v1617_v3 }
   0xf   :  { %380 = vmatpush.msrb.mxu1 %v1625_v5 }
  0x10   :  { %305 = vmatpush.msrb.mxu2 %v1625_v5 }
  0x11   :  { %381 = vmatpush.msrb.mxu1 %v1636_v7  ;;  %1382 = vmatmul.msk.f32.gmra.mxu0 %vm54_vm0, %v39_v36 }
  0x12   :  { %306 = vmatpush.msrb.mxu2 %v1636_v7 }
  0x13   :  { %603 = vmatpush.msra.mxu1 %v1608_v1 }
  0x15   :  { %604 = vmatpush.msra.mxu1 %v1617_v3 }
  0x17   :  { %605 = vmatpush.msra.mxu1 %v1625_v5 }
  0x19   :  { %606 = vmatpush.msra.mxu1 %v1636_v7  ;;  %1383 = vmatmul.msk.f32.gmra.mxu0 %vm54_vm0, %v40_v8 }
  0x86   :  { %v96_v12 = vpop.f32.mrf.mxu0 }
  0x87   :  { %v158_v13 = vpop.f32.mrf.mxu1  ;;  %v97_v14 = vadd.f32 %v1666_v10, %v96_v12 }
  0x88   :  { %v159_v15 = vadd.f32 %v1432_v11, %v158_v13 }
  0x89   :  { %121 = vst.msk [vmem:[#allocation2] sm:$0xff] %vm120_vm1, %v97_v14 }
  0x8a   :  { %182 = vrot.lane.b32.xlu0 %v159_v15, %s1540_s18 }
  0x8e   :  { %v99_v42 = vpop.f32.mrf.mxu0 }
  0x8f   :  { %v100_v43 = vadd.f32 %v1666_v10, %v99_v42 }
  0x90   :  { %v129_v16 = vld [vmem:[#allocation2] sm:$0xff] }
  0x91   :  { %v161_v17 = vadd.f32 %v159_v15, %v129_v16  ;;  %122 = vst.msk [vmem:[#allocation2 + $0x8] sm:$0xff] %vm120_vm1, %v100_v43 }
  0x93   :  { %v1389_v18 = vmul.f32 -1.442695, %v161_v17 }
  0x95   :  { %1443 = vpow2.f32 %v1389_v18 }
  0x98   :  { %v205_v48 = vld [vmem:[#allocation2 + $0x8] sm:$0xff] }
  0x9b   :  { %v1444_v19 = vpop.eup %1443 }
  0x9c   :  { %v165_v20 = vadd.f32 1.0, %v1444_v19  ;;  %v1434_v19 = vld [vmem:[%s1979_s4] ss:$0 sm:$0xff] }
  0x9e   :  { %1445 = vrcp.f32 %v165_v20  ;;  %v177_v26 = vand.u32 2147483648, %v165_v20  ;;  %vm171_vm3 = vweird.f32 %v165_v20  ;;  %v175_v27 = vand.u32 2147483647, %v165_v20 }
  0xa0   :  { %v178_v29 = vor.u32 1.1754944e-38, %v177_v26  ;;  %vm176_vm5 = vcmp.eq.f32.partialorder %v175_v27, 8.507059e+37 }
  0xa4   :  { %v1446_v21 = vpop.eup %1445 }
  0xa5   :  { %v167_v22 = vmul.f32 %v1446_v21, %v165_v20  ;;  %vm172_vm2 = vweird.f32 %v1446_v21 }
  0xa6   :  { %vm173_vm4 = vmor %vm171_vm3, %vm172_vm2 }
  0xa7   :  { %v168_v23 = vsub.f32 1.0, %v167_v22 }
  0xa9   :  { %v169_v24 = vmul.f32 %v1446_v21, %v168_v23 }
  0xab   :  { %v170_v25 = vadd.f32 %v1446_v21, %v169_v24 }
  0xad   :  { %v174_v28 = vsel %vm173_vm4, %v1446_v21, %v170_v25 }
  0xae   :  { %v179_v31 = vsel %vm176_vm5, %v178_v29, %v174_v28 }
  0xaf   :  { %v192_v37 = vsub.f32 1.0, %v179_v31  ;;  %v198_v39 = vmul.f32 0.0, %v179_v31 }
  0xfc   :  { %v183_v30 = vpop.permute.xlu0 %182 }
  0xfd   :  { %v185_v32 = vmul.f32 %v183_v30, %v179_v31 }
  0xff   :  { %187 = vrot.lane.b32.xlu0 %v185_v32, %s1540_s18 }
 0x171   :  { %v188_v33 = vpop.permute.xlu0 %187 }
 0x172   :  { %v190_v34 = vadd.f32 %v188_v33, %v129_v16  ;;  %v102_v16 = vpop.f32.mrf.mxu0 }
 0x173   :  { %v103_v17 = vadd.f32 %v1666_v10, %v102_v16 }
 0x174   :  { %1447 = vtanh.f32 %v190_v34 }
 0x175   :  { %123 = vst.msk [vmem:[#allocation2 + $0x10] sm:$0xff] %vm120_vm1, %v103_v17 }
 0x17a   :  { %v1448_v35 = vpop.eup %1447 }
 0x17b   :  { %194 = vrot.lane.b32.xlu1 %v1448_v35, %s1541_s2 }
 0x17c   :  { %v280_v22 = vld [vmem:[#allocation2 + $0x10] sm:$0xff] }
 0x1ed   :  { %v195_v38 = vpop.permute.xlu1 %194 }
 0x1ee   :  { %v197_v40 = vmul.f32 %v195_v38, %v192_v37  ;;  %v41_v38 = vld [vmem:[%s1977_s0 + $0x18] sm:$0xff] }
 0x1ef   :  { %1384 = vmatmul.msk.f32.gmra.mxu0 %vm54_vm0, %v41_v38 }
 0x1f0   :  { %v199_v41 = vadd.f32 %v198_v39, %v197_v40 }
 0x1f2   :  { %201 = vrot.lane.b32.xlu1 %v199_v41, %s1541_s2 }
 0x264   :  { %v202_v44 = vpop.permute.xlu1 %201 }
 0x265   :  { %204 = vst.msk [vmem:[#allocation3] sm:$0xff] %vm54_vm0, %v202_v44  ;;  %1390 = vmatmul.msk.f32.vlgmr.msra.gmra.mxu2 %vm54_vm0, %v202_v44 }
 0x266   :  { %453 = vmatpush.msra.mxu2 %v1608_v1 }
 0x268   :  { %454 = vmatpush.msra.mxu2 %v1617_v3 }
 0x26a   :  { %455 = vmatpush.msra.mxu2 %v1625_v5 }
 0x26c   :  { %456 = vmatpush.msra.mxu2 %v1636_v7 }
 0x2e8   :  { %v233_v46 = vpop.f32.mrf.mxu2 }
 0x2e9   :  { %v234_v47 = vadd.f32 %v1433_v45, %v233_v46  ;;  %v105_v45 = vpop.f32.mrf.mxu0 }
 0x2ea   :  { %v106_v46 = vadd.f32 %v1666_v10, %v105_v45 }
 0x2eb   :  { %257 = vrot.lane.b32.xlu2 %v234_v47, %s1540_s18  ;;  %v236_v49 = vadd.f32 %v234_v47, %v205_v48  ;;  %v1435_v47 = vld [vmem:[%s1979_s4] ss:$0 sm:$0xff] }
 0x2ec   :  { %124 = vst.msk [vmem:[#allocation2 + $0x18] sm:$0xff] %vm120_vm1, %v106_v46  ;;  %v741_v46 = vld [vmem:[%s1980_s5 + $0x18] sm:$0xff] }
 0x2ed   :  { %v1391_v50 = vmul.f32 -1.442695, %v236_v49  ;;  %782 = vmatpush.msrb.mxu3 %v741_v46 }
 0x2ef   :  { %1449 = vpow2.f32 %v1391_v50 }
 0x2f3   :  { %v355_v50 = vld [vmem:[#allocation2 + $0x18] sm:$0xff] }
 0x2f5   :  { %v1450_v51 = vpop.eup %1449 }
 0x2f6   :  { %v240_v52 = vadd.f32 1.0, %v1450_v51 }
 0x2f8   :  { %1451 = vrcp.f32 %v240_v52  ;;  %v252_v58 = vand.u32 2147483648, %v240_v52  ;;  %vm246_vm7 = vweird.f32 %v240_v52  ;;  %v250_v59 = vand.u32 2147483647, %v240_v52 }
 0x2fa   :  { %v253_v61 = vor.u32 1.1754944e-38, %v252_v58  ;;  %vm251_vm9 = vcmp.eq.f32.partialorder %v250_v59, 8.507059e+37 }
 0x2fe   :  { %v1452_v53 = vpop.eup %1451 }
 0x2ff   :  { %v242_v54 = vmul.f32 %v1452_v53, %v240_v52  ;;  %vm247_vm6 = vweird.f32 %v1452_v53 }
 0x300   :  { %vm248_vm8 = vmor %vm246_vm7, %vm247_vm6 }
 0x301   :  { %v243_v55 = vsub.f32 1.0, %v242_v54 }
 0x303   :  { %v244_v56 = vmul.f32 %v1452_v53, %v243_v55 }
 0x305   :  { %v245_v57 = vadd.f32 %v1452_v53, %v244_v56 }
 0x307   :  { %v249_v60 = vsel %vm248_vm8, %v1452_v53, %v245_v57 }
 0x308   :  { %v254_v63 = vsel %vm251_vm9, %v253_v61, %v249_v60 }
 0x309   :  { %v267_v11 = vsub.f32 1.0, %v254_v63  ;;  %v273_v13 = vmul.f32 %v254_v63, %v199_v41 }
 0x345   :  { %v258_v62 = vpop.permute.xlu2 %257 }
 0x346   :  { %v260_v0 = vmul.f32 %v258_v62, %v254_v63 }
 0x348   :  { %262 = vrot.lane.b32.xlu2 %v260_v0, %s1540_s18 }
 0x3a2   :  { %v263_v2 = vpop.permute.xlu2 %262 }
 0x3a3   :  { %v265_v4 = vadd.f32 %v263_v2, %v205_v48 }
 0x3a5   :  { %1453 = vtanh.f32 %v265_v4 }
 0x3ab   :  { %v1454_v6 = vpop.eup %1453 }
 0x3ac   :  { %269 = vrot.lane.b32.xlu0 %v1454_v6, %s1541_s2 }
 0x41e   :  { %v270_v12 = vpop.permute.xlu0 %269 }
 0x41f   :  { %v272_v14 = vmul.f32 %v270_v12, %v267_v11  ;;  %v42_v12 = vld [vmem:[%s1977_s0 + $0x20] sm:$0xff] }
 0x420   :  { %1385 = vmatmul.msk.f32.gmra.mxu0 %vm54_vm0, %v42_v12 }
 0x421   :  { %v274_v15 = vadd.f32 %v273_v13, %v272_v14 }
 0x423   :  { %276 = vrot.lane.b32.xlu1 %v274_v15, %s1541_s2 }
 0x495   :  { %v277_v18 = vpop.permute.xlu1 %276 }
 0x496   :  { %279 = vst.msk [vmem:[#allocation3 + $0x8] sm:$0xff] %vm54_vm0, %v277_v18  ;;  %1392 = vmatmul.msk.f32.vlgmr.msrb.gmra.mxu2 %vm54_vm0, %v277_v18 }
 0x497   :  { %678 = vmatpush.msrb.mxu2 %v1608_v1 }
 0x499   :  { %679 = vmatpush.msrb.mxu2 %v1617_v3 }
 0x49b   :  { %680 = vmatpush.msrb.mxu2 %v1625_v5 }
 0x49d   :  { %681 = vmatpush.msrb.mxu2 %v1636_v7  ;;  %v108_v18 = vpop.f32.mrf.mxu0 }
 0x519   :  { %v308_v20 = vpop.f32.mrf.mxu2 }
 0x51a   :  { %v309_v21 = vadd.f32 %v1434_v19, %v308_v20  ;;  %v109_v19 = vadd.f32 %v1666_v10, %v108_v18 }
 0x51c   :  { %332 = vrot.lane.b32.xlu2 %v309_v21, %s1540_s18  ;;  %v311_v23 = vadd.f32 %v309_v21, %v280_v22  ;;  %125 = vst.msk [vmem:[#allocation2 + $0x20] sm:$0xff] %vm120_vm1, %v109_v19  ;;  %v1436_v21 = vld [vmem:[%s1979_s4] ss:$0 sm:$0xff] }
 0x51e   :  { %v1393_v24 = vmul.f32 -1.442695, %v311_v23 }
 0x520   :  { %1455 = vpow2.f32 %v1393_v24 }
 0x523   :  { %v430_v24 = vld [vmem:[#allocation2 + $0x20] sm:$0xff] }
 0x526   :  { %v1456_v25 = vpop.eup %1455 }
 0x527   :  { %v315_v1 = vadd.f32 1.0, %v1456_v25 }
 0x529   :  { %1457 = vrcp.f32 %v315_v1  ;;  %v327_v28 = vand.u32 2147483648, %v315_v1  ;;  %vm321_vm11 = vweird.f32 %v315_v1  ;;  %v325_v29 = vand.u32 2147483647, %v315_v1 }
 0x52b   :  { %v328_v31 = vor.u32 1.1754944e-38, %v327_v28  ;;  %vm326_vm13 = vcmp.eq.f32.partialorder %v325_v29, 8.507059e+37 }
 0x52f   :  { %v1458_v3 = vpop.eup %1457 }
 0x530   :  { %v317_v26 = vmul.f32 %v1458_v3, %v315_v1  ;;  %vm322_vm10 = vweird.f32 %v1458_v3 }
 0x531   :  { %vm323_vm12 = vmor %vm321_vm11, %vm322_vm10 }
 0x532   :  { %v318_v5 = vsub.f32 1.0, %v317_v26 }
 0x534   :  { %v319_v27 = vmul.f32 %v1458_v3, %v318_v5 }
 0x536   :  { %v320_v7 = vadd.f32 %v1458_v3, %v319_v27 }
 0x538   :  { %v324_v30 = vsel %vm323_vm12, %v1458_v3, %v320_v7 }
 0x539   :  { %v329_v33 = vsel %vm326_vm13, %v328_v31, %v324_v30 }
 0x53a   :  { %v342_v39 = vsub.f32 1.0, %v329_v33  ;;  %v348_v41 = vmul.f32 %v329_v33, %v274_v15 }
 0x576   :  { %v333_v32 = vpop.permute.xlu2 %332 }
 0x577   :  { %v335_v34 = vmul.f32 %v333_v32, %v329_v33 }
 0x579   :  { %337 = vrot.lane.b32.xlu0 %v335_v34, %s1540_s18 }
 0x5eb   :  { %v338_v35 = vpop.permute.xlu0 %337 }
 0x5ec   :  { %v340_v36 = vadd.f32 %v338_v35, %v280_v22 }
 0x5ee   :  { %1459 = vtanh.f32 %v340_v36 }
 0x5f4   :  { %v1460_v37 = vpop.eup %1459 }
 0x5f5   :  { %344 = vrot.lane.b32.xlu1 %v1460_v37, %s1541_s2 }
 0x667   :  { %v345_v40 = vpop.permute.xlu1 %344 }
 0x668   :  { %v347_v42 = vmul.f32 %v345_v40, %v342_v39  ;;  %v43_v40 = vld [vmem:[%s1977_s0 + $0x28] sm:$0xff] }
 0x669   :  { %1386 = vmatmul.msk.f32.gmra.mxu0 %vm54_vm0, %v43_v40 }
 0x66a   :  { %v349_v43 = vadd.f32 %v348_v41, %v347_v42 }
 0x66c   :  { %351 = vrot.lane.b32.xlu2 %v349_v43, %s1541_s2 }
 0x6c6   :  { %v352_v44 = vpop.permute.xlu2 %351 }
 0x6c7   :  { %354 = vst.msk [vmem:[#allocation3 + $0x10] sm:$0xff] %vm54_vm0, %v352_v44  ;;  %1394 = vmatmul.msk.f32.vlgmr.msrb.gmra.mxu1 %vm54_vm0, %v352_v44 }
 0x744   :  { %v383_v48 = vpop.f32.mrf.mxu1 }
 0x745   :  { %v384_v49 = vadd.f32 %v1435_v47, %v383_v48  ;;  %v740_v47 = vld [vmem:[%s1980_s5 + $0x10] sm:$0xff]  ;;  %v739_v48 = vld [vmem:[%s1980_s5 + $0x8] sm:$0xff] }
 0x746   :  { %783 = vmatpush.msrb.mxu3 %v740_v47 }
 0x747   :  { %407 = vrot.lane.b32.xlu0 %v384_v49, %s1540_s18  ;;  %v386_v51 = vadd.f32 %v384_v49, %v355_v50  ;;  %v738_v49 = vld [vmem:[%s1980_s5] sm:$0xff] }
 0x748   :  { %784 = vmatpush.msrb.mxu3 %v739_v48 }
 0x749   :  { %v1395_v52 = vmul.f32 -1.442695, %v386_v51  ;;  %v730_v51 = vld [vmem:[#allocation3] sm:$0xff] }
 0x74a   :  { %785 = vmatpush.msrb.mxu3 %v738_v49 }
 0x74b   :  { %1461 = vpow2.f32 %v1395_v52  ;;  %v111_v52 = vpop.f32.mrf.mxu0 }
 0x751   :  { %v1462_v53 = vpop.eup %1461 }
 0x752   :  { %v390_v54 = vadd.f32 1.0, %v1462_v53  ;;  %v112_v53 = vadd.f32 %v1666_v10, %v111_v52 }
 0x754   :  { %1463 = vrcp.f32 %v390_v54  ;;  %v402_v60 = vand.u32 2147483648, %v390_v54  ;;  %vm396_vm15 = vweird.f32 %v390_v54  ;;  %v400_v61 = vand.u32 2147483647, %v390_v54  ;;  %126 = vst.msk [vmem:[#allocation2 + $0x28] sm:$0xff] %vm120_vm1, %v112_v53 }
 0x756   :  { %v403_v63 = vor.u32 1.1754944e-38, %v402_v60  ;;  %vm401_vm3 = vcmp.eq.f32.partialorder %v400_v61, 8.507059e+37  ;;  %v1780_v61 = vld [vmem:[%s1981_s6] ss:$0 sm:$0xff] }
 0x75a   :  { %v1464_v55 = vpop.eup %1463 }
 0x75b   :  { %v392_v56 = vmul.f32 %v1464_v55, %v390_v54  ;;  %vm397_vm14 = vweird.f32 %v1464_v55  ;;  %v731_v54 = vld [vmem:[#allocation3 + $0x8] sm:$0xff] }
 0x75c   :  { %vm398_vm2 = vmor %vm396_vm15, %vm397_vm14 }
 0x75d   :  { %v393_v57 = vsub.f32 1.0, %v392_v56 }
 0x75f   :  { %v394_v58 = vmul.f32 %v1464_v55, %v393_v57 }
 0x761   :  { %v395_v59 = vadd.f32 %v1464_v55, %v394_v58  ;;  %v1437_v58 = vld [vmem:[%s1979_s4] ss:$0 sm:$0xff] }
 0x763   :  { %v399_v62 = vsel %vm398_vm2, %v1464_v55, %v395_v59  ;;  %v732_v55 = vld [vmem:[#allocation3 + $0x10] sm:$0xff] }
 0x764   :  { %v404_v2 = vsel %vm401_vm3, %v403_v63, %v399_v62 }
 0x765   :  { %v417_v13 = vsub.f32 1.0, %v404_v2  ;;  %v423_v15 = vmul.f32 %v404_v2, %v349_v43 }
 0x7b9   :  { %v408_v0 = vpop.permute.xlu0 %407 }
 0x7ba   :  { %v410_v4 = vmul.f32 %v408_v0, %v404_v2 }
 0x7bc   :  { %412 = vrot.lane.b32.xlu1 %v410_v4, %s1540_s18 }
 0x82e   :  { %v413_v6 = vpop.permute.xlu1 %412 }
 0x82f   :  { %v415_v8 = vadd.f32 %v413_v6, %v355_v50 }
 0x831   :  { %1465 = vtanh.f32 %v415_v8 }
 0x837   :  { %v1466_v11 = vpop.eup %1465 }
 0x838   :  { %419 = vrot.lane.b32.xlu2 %v1466_v11, %s1541_s2 }
 0x892   :  { %v420_v14 = vpop.permute.xlu2 %419 }
 0x893   :  { %v422_v16 = vmul.f32 %v420_v14, %v417_v13  ;;  %v505_v13 = vld [vmem:[#allocation2 + $0x28] sm:$0xff] }
 0x895   :  { %v424_v17 = vadd.f32 %v423_v15, %v422_v16 }
 0x897   :  { %426 = vrot.lane.b32.xlu0 %v424_v17, %s1541_s2 }
 0x909   :  { %v427_v20 = vpop.permute.xlu0 %426 }
 0x90a   :  { %429 = vst.msk [vmem:[#allocation3 + $0x18] sm:$0xff] %vm54_vm0, %v427_v20  ;;  %1396 = vmatmul.msk.f32.vlgmr.msra.gmra.mxu2 %vm54_vm0, %v427_v20 }
 0x911   :  { %v733_v56 = vld [vmem:[#allocation3 + $0x18] sm:$0xff] }
 0x98d   :  { %v458_v22 = vpop.f32.mrf.mxu2 }
 0x98e   :  { %v459_v23 = vadd.f32 %v1436_v21, %v458_v22 }
 0x990   :  { %482 = vrot.lane.b32.xlu1 %v459_v23, %s1540_s18  ;;  %v461_v25 = vadd.f32 %v459_v23, %v430_v24 }
 0x992   :  { %v1397_v1 = vmul.f32 -1.442695, %v461_v25 }
 0x994   :  { %1467 = vpow2.f32 %v1397_v1 }
 0x99a   :  { %v1468_v3 = vpop.eup %1467 }
 0x99b   :  { %v465_v26 = vadd.f32 1.0, %v1468_v3 }
 0x99d   :  { %1469 = vrcp.f32 %v465_v26  ;;  %v477_v30 = vand.u32 2147483648, %v465_v26  ;;  %vm471_vm5 = vweird.f32 %v465_v26  ;;  %v475_v31 = vand.u32 2147483647, %v465_v26 }
 0x99f   :  { %v478_v33 = vor.u32 1.1754944e-38, %v477_v30  ;;  %vm476_vm7 = vcmp.eq.f32.partialorder %v475_v31, 8.507059e+37  ;;  %v44_v30 = vld [vmem:[%s1977_s0 + $0x30] sm:$0xff] }
 0x9a0   :  { %1387 = vmatmul.msk.f32.gmra.mxu0 %vm54_vm0, %v44_v30  ;;  %v45_v30 = vld [vmem:[%s1977_s0 + $0x38] sm:$0xff] }
 0x9a3   :  { %v1470_v5 = vpop.eup %1469 }
 0x9a4   :  { %v467_v27 = vmul.f32 %v1470_v5, %v465_v26  ;;  %vm472_vm4 = vweird.f32 %v1470_v5 }
 0x9a5   :  { %vm473_vm6 = vmor %vm471_vm5, %vm472_vm4 }
 0x9a6   :  { %v468_v7 = vsub.f32 1.0, %v467_v27 }
 0x9a8   :  { %v469_v28 = vmul.f32 %v1470_v5, %v468_v7  ;;  %1388 = vmatmul.msk.f32.gmra.mxu0 %vm54_vm0, %v45_v30 }
 0x9aa   :  { %v470_v29 = vadd.f32 %v1470_v5, %v469_v28 }
 0x9ac   :  { %v474_v32 = vsel %vm473_vm6, %v1470_v5, %v470_v29 }
 0x9ad   :  { %v479_v35 = vsel %vm476_vm7, %v478_v33, %v474_v32 }
 0x9ae   :  { %v492_v41 = vsub.f32 1.0, %v479_v35  ;;  %v498_v43 = vmul.f32 %v479_v35, %v424_v17 }
 0xa02   :  { %v483_v34 = vpop.permute.xlu1 %482 }
 0xa03   :  { %v485_v36 = vmul.f32 %v483_v34, %v479_v35 }
 0xa05   :  { %487 = vrot.lane.b32.xlu2 %v485_v36, %s1540_s18  ;;  %v1806_v36 = vld [vmem:[%s1982_s7 + $0x18] sm:$0xff] }
 0xa06   :  { %840 = vmatpush.msrb.mxu1 %v1806_v36  ;;  %905 = vmatpush.msra.mxu2 %v1806_v36 }
 0xa5f   :  { %v488_v37 = vpop.permute.xlu2 %487 }
 0xa60   :  { %v490_v38 = vadd.f32 %v488_v37, %v430_v24  ;;  %v1811_v37 = vld [vmem:[%s1982_s7 + $0x10] sm:$0xff] }
 0xa61   :  { %841 = vmatpush.msrb.mxu1 %v1811_v37  ;;  %906 = vmatpush.msra.mxu2 %v1811_v37 }
 0xa62   :  { %1471 = vtanh.f32 %v490_v38  ;;  %v1818_v38 = vld [vmem:[%s1982_s7 + $0x8] sm:$0xff] }
 0xa63   :  { %842 = vmatpush.msrb.mxu1 %v1818_v38  ;;  %907 = vmatpush.msra.mxu2 %v1818_v38 }
 0xa68   :  { %v1472_v39 = vpop.eup %1471 }
 0xa69   :  { %494 = vrot.lane.b32.xlu0 %v1472_v39, %s1541_s2  ;;  %v1825_v39 = vld [vmem:[%s1982_s7] sm:$0xff] }
 0xa6a   :  { %843 = vmatpush.msrb.mxu1 %v1825_v39  ;;  %908 = vmatpush.msra.mxu2 %v1825_v39 }
 0xadb   :  { %v495_v42 = vpop.permute.xlu0 %494 }
 0xadc   :  { %v497_v44 = vmul.f32 %v495_v42, %v492_v41  ;;  %v114_v41 = vpop.f32.mrf.mxu0 }
 0xadd   :  { %v115_v42 = vadd.f32 %v1666_v10, %v114_v41 }
 0xade   :  { %v1748_v45 = vadd.f32 %v498_v43, %v497_v44  ;;  %v1439_v44 = vld [vmem:[%s1979_s4] ss:$0 sm:$0xff] }
 0xadf   :  { %127 = vst.msk [vmem:[#allocation2 + $0x30] sm:$0xff] %vm120_vm1, %v115_v42 }
 0xae0   :  { %501 = vrot.lane.b32.xlu1 %v1748_v45, %s1541_s2 }
 0xb52   :  { %v502_v50 = vpop.permute.xlu1 %501 }
 0xb53   :  { %504 = vst.msk [vmem:[#allocation3 + $0x20] sm:$0xff] %vm54_vm0, %v502_v50  ;;  %1398 = vmatmul.msk.f32.vlgmr.msra.gmra.mxu3 %vm54_vm0, %v502_v50 }
 0xb5a   :  { %v734_v57 = vld [vmem:[#allocation3 + $0x20] sm:$0xff] }
 0xb5b   :  { %1404 = vmatmul.msk.f32.vlgmr.msrb.gmra.mxu3 %vm54_vm0, %v730_v51  ;;  %v580_v51 = vld [vmem:[#allocation2 + $0x30] sm:$0xff] }
 0xb63   :  { %1405 = vmatmul.msk.f32.gmra.mxu3 %vm54_vm0, %v731_v54 }
 0xb6b   :  { %1406 = vmatmul.msk.f32.gmra.mxu3 %vm54_vm0, %v732_v55 }
 0xb73   :  { %1407 = vmatmul.msk.f32.gmra.mxu3 %vm54_vm0, %v733_v56 }
 0xb7b   :  { %1408 = vmatmul.msk.f32.gmra.mxu3 %vm54_vm0, %v734_v57 }
 0xbd6   :  { %v533_v59 = vpop.f32.mrf.mxu3 }
 0xbd7   :  { %v534_v60 = vadd.f32 %v1437_v58, %v533_v59 }
 0xbd9   :  { %557 = vrot.lane.b32.xlu2 %v534_v60, %s1540_s18  ;;  %v536_v15 = vadd.f32 %v534_v60, %v505_v13 }
 0xbdb   :  { %v1399_v16 = vmul.f32 -1.442695, %v536_v15 }
 0xbdd   :  { %1473 = vpow2.f32 %v1399_v16 }
 0xbde   :  { %v787_v62 = vpop.f32.mrf.mxu3 }
 0xbdf   :  { %v788_v63 = vadd.f32 %v1780_v61, %v787_v62 }
 0xbe1   :  { %811 = vst.msk [vmem:[#allocation2] sm:$0xff] %vm120_vm1, %v788_v63 }
 0xbe3   :  { %v1474_v17 = vpop.eup %1473 }
 0xbe4   :  { %v540_v18 = vadd.f32 1.0, %v1474_v17 }
 0xbe6   :  { %v790_v0 = vpop.f32.mrf.mxu3  ;;  %1475 = vrcp.f32 %v540_v18  ;;  %v552_v24 = vand.u32 2147483648, %v540_v18  ;;  %vm546_vm9 = vweird.f32 %v540_v18  ;;  %v550_v25 = vand.u32 2147483647, %v540_v18 }
 0xbe7   :  { %v791_v2 = vadd.f32 %v1780_v61, %v790_v0 }
 0xbe8   :  { %v553_v3 = vor.u32 1.1754944e-38, %v552_v24  ;;  %vm551_vm11 = vcmp.eq.f32.partialorder %v550_v25, 8.507059e+37  ;;  %v819_v54 = vld [vmem:[#allocation2] sm:$0xff] }
 0xbe9   :  { %812 = vst.msk [vmem:[#allocation2 + $0x8] sm:$0xff] %vm120_vm1, %v791_v2 }
 0xbec   :  { %v1476_v19 = vpop.eup %1475 }
 0xbed   :  { %v542_v20 = vmul.f32 %v1476_v19, %v540_v18  ;;  %vm547_vm8 = vweird.f32 %v1476_v19 }
 0xbee   :  { %v793_v4 = vpop.f32.mrf.mxu3  ;;  %vm548_vm10 = vmor %vm546_vm9, %vm547_vm8 }
 0xbef   :  { %v794_v6 = vadd.f32 %v1780_v61, %v793_v4  ;;  %v543_v21 = vsub.f32 1.0, %v542_v20 }
 0xbf1   :  { %813 = vst.msk [vmem:[#allocation2 + $0x10] sm:$0xff] %vm120_vm1, %v794_v6  ;;  %v544_v22 = vmul.f32 %v1476_v19, %v543_v21 }
 0xbf3   :  { %v545_v23 = vadd.f32 %v1476_v19, %v544_v22 }
 0xbf5   :  { %v549_v1 = vsel %vm548_vm10, %v1476_v19, %v545_v23 }
 0xbf6   :  { %v796_v8 = vpop.f32.mrf.mxu3  ;;  %v554_v5 = vsel %vm551_vm11, %v553_v3, %v549_v1 }
 0xbf7   :  { %v797_v11 = vadd.f32 %v1780_v61, %v796_v8  ;;  %v567_v31 = vsub.f32 1.0, %v554_v5  ;;  %v573_v33 = vmul.f32 %v554_v5, %v1748_v45 }
 0xbf9   :  { %814 = vst.msk [vmem:[#allocation2 + $0x18] sm:$0xff] %vm120_vm1, %v797_v11 }
 0xbfe   :  { %v799_v12 = vpop.f32.mrf.mxu3 }
 0xbff   :  { %v800_v14 = vadd.f32 %v1780_v61, %v799_v12 }
 0xc01   :  { %815 = vst.msk [vmem:[#allocation2 + $0x20] sm:$0xff] %vm120_vm1, %v800_v14 }
 0xc33   :  { %v558_v26 = vpop.permute.xlu2 %557 }
 0xc34   :  { %v560_v27 = vmul.f32 %v558_v26, %v554_v5 }
 0xc36   :  { %562 = vrot.lane.b32.xlu0 %v560_v27, %s1540_s18 }
 0xca8   :  { %v563_v7 = vpop.permute.xlu0 %562 }
 0xca9   :  { %v565_v28 = vadd.f32 %v563_v7, %v505_v13 }
 0xcab   :  { %1477 = vtanh.f32 %v565_v28 }
 0xcb1   :  { %v1478_v29 = vpop.eup %1477 }
 0xcb2   :  { %569 = vrot.lane.b32.xlu1 %v1478_v29, %s1541_s2 }
 0xd24   :  { %v570_v32 = vpop.permute.xlu1 %569 }
 0xd25   :  { %v572_v34 = vmul.f32 %v570_v32, %v567_v31 }
 0xd27   :  { %v1799_v35 = vadd.f32 %v573_v33, %v572_v34 }
 0xd29   :  { %576 = vrot.lane.b32.xlu2 %v1799_v35, %s1541_s2 }
 0xd83   :  { %v577_v40 = vpop.permute.xlu2 %576 }
 0xd84   :  { %579 = vst.msk [vmem:[#allocation3 + $0x28] sm:$0xff] %vm54_vm0, %v577_v40  ;;  %1400 = vmatmul.msk.f32.vlgmr.msra.gmra.mxu1 %vm54_vm0, %v577_v40 }
 0xd85   :  { %970 = vmatpush.msra.mxu1 %v1806_v36 }
 0xd87   :  { %971 = vmatpush.msra.mxu1 %v1811_v37 }
 0xd89   :  { %972 = vmatpush.msra.mxu1 %v1818_v38 }
 0xd8b   :  { %v735_v43 = vld [vmem:[#allocation3 + $0x28] sm:$0xff]  ;;  %973 = vmatpush.msra.mxu1 %v1825_v39 }
 0xd8c   :  { %1409 = vmatmul.msk.f32.gmra.mxu3 %vm54_vm0, %v735_v43  ;;  %844 = vmatmul.f32.vlgmr.msrb.gmra.mxu1 %v1539_v9  ;;  %v1852_v9 = vld [vmem:[%s1983_s8] ss:$0 sm:$0xff] }
 0xd8d   :  { %1100 = vmatpush.msrb.mxu1 %v1806_v36 }
 0xd8f   :  { %1101 = vmatpush.msrb.mxu1 %v1811_v37 }
 0xd91   :  { %1102 = vmatpush.msrb.mxu1 %v1818_v38 }
 0xd93   :  { %1103 = vmatpush.msrb.mxu1 %v1825_v39 }
 0xe01   :  { %v608_v45 = vpop.f32.mrf.mxu1 }
 0xe02   :  { %v609_v46 = vadd.f32 %v1439_v44, %v608_v45 }
 0xe04   :  { %632 = vrot.lane.b32.xlu0 %v609_v46, %s1540_s18  ;;  %v611_v52 = vadd.f32 %v609_v46, %v580_v51  ;;  %v117_v46 = vpop.f32.mrf.mxu0 }
 0xe06   :  { %v1401_v53 = vmul.f32 -1.442695, %v611_v52 }
 0xe08   :  { %1479 = vpow2.f32 %v1401_v53 }
 0xe09   :  { %v845_v47 = vpop.f32.mrf.mxu1 }
 0xe0a   :  { %v846_v48 = vadd.f32 %v1852_v9, %v845_v47  ;;  %v118_v47 = vadd.f32 %v1666_v10, %v117_v46 }
 0xe0c   :  { %869 = vrot.lane.b32.xlu1 %v846_v48, %s1540_s18  ;;  %v848_v55 = vadd.f32 %v846_v48, %v819_v54  ;;  %128 = vst.msk [vmem:[#allocation2 + $0x38] sm:$0xff] %vm120_vm1, %v118_v47 }
 0xe0e   :  { %v1412_v56 = vmul.f32 -1.442695, %v848_v55  ;;  %v1480_v57 = vpop.eup %1479 }
 0xe0f   :  { %v802_v49 = vpop.f32.mrf.mxu3  ;;  %v615_v58 = vadd.f32 1.0, %v1480_v57 }
 0xe10   :  { %v803_v50 = vadd.f32 %v1780_v61, %v802_v49  ;;  %1481 = vpow2.f32 %v1412_v56 }
 0xe11   :  { %1483 = vrcp.f32 %v615_v58  ;;  %v627_v12 = vand.u32 2147483648, %v615_v58  ;;  %vm621_vm13 = vweird.f32 %v615_v58  ;;  %v625_v13 = vand.u32 2147483647, %v615_v58 }
 0xe12   :  { %816 = vst.msk [vmem:[#allocation2 + $0x28] sm:$0xff] %vm120_vm1, %v803_v50 }
 0xe13   :  { %v628_v16 = vor.u32 1.1754944e-38, %v627_v12  ;;  %vm626_vm15 = vcmp.eq.f32.partialorder %v625_v13, 8.507059e+37 }
 0xe16   :  { %v1482_v59 = vpop.eup %1481 }
 0xe17   :  { %v852_v60 = vadd.f32 1.0, %v1482_v59  ;;  %v1484_v62 = vpop.eup %1483 }
 0xe18   :  { %v617_v63 = vmul.f32 %v1484_v62, %v615_v58  ;;  %vm622_vm12 = vweird.f32 %v1484_v62 }
 0xe19   :  { %1485 = vrcp.f32 %v852_v60  ;;  %vm623_vm14 = vmor %vm621_vm13, %vm622_vm12  ;;  %v864_v21 = vand.u32 2147483648, %v852_v60  ;;  %vm858_vm3 = vweird.f32 %v852_v60  ;;  %v862_v22 = vand.u32 2147483647, %v852_v60 }
 0xe1a   :  { %v618_v0 = vsub.f32 1.0, %v617_v63 }
 0xe1b   :  { %v865_v24 = vor.u32 1.1754944e-38, %v864_v21  ;;  %vm863_vm5 = vcmp.eq.f32.partialorder %v862_v22, 8.507059e+37 }
 0xe1c   :  { %v619_v4 = vmul.f32 %v1484_v62, %v618_v0 }
 0xe1e   :  { %v620_v8 = vadd.f32 %v1484_v62, %v619_v4 }
 0xe1f   :  { %v1486_v2 = vpop.eup %1485 }
 0xe20   :  { %v854_v6 = vmul.f32 %v1486_v2, %v852_v60  ;;  %v624_v14 = vsel %vm623_vm14, %v1484_v62, %v620_v8  ;;  %vm859_vm2 = vweird.f32 %v1486_v2 }
 0xe21   :  { %v629_v18 = vsel %vm626_vm15, %v628_v16, %v624_v14  ;;  %vm860_vm4 = vmor %vm858_vm3, %vm859_vm2 }
 0xe22   :  { %v855_v11 = vsub.f32 1.0, %v854_v6  ;;  %v642_v31 = vsub.f32 1.0, %v629_v18  ;;  %v648_v33 = vmul.f32 %v629_v18, %v1799_v35 }
 0xe24   :  { %v856_v15 = vmul.f32 %v1486_v2, %v855_v11 }
 0xe26   :  { %v857_v20 = vadd.f32 %v1486_v2, %v856_v15 }
 0xe28   :  { %v861_v23 = vsel %vm860_vm4, %v1486_v2, %v857_v20 }
 0xe29   :  { %v866_v1 = vsel %vm863_vm5, %v865_v24, %v861_v23 }
 0xe2a   :  { %v879_v41 = vsub.f32 1.0, %v866_v1  ;;  %v885_v43 = vmul.f32 0.0, %v866_v1 }
 0xe76   :  { %v633_v17 = vpop.permute.xlu0 %632 }
 0xe77   :  { %v635_v19 = vmul.f32 %v633_v17, %v629_v18 }
 0xe79   :  { %637 = vrot.lane.b32.xlu2 %v635_v19, %s1540_s18 }
 0xe7e   :  { %v870_v25 = vpop.permute.xlu1 %869 }
 0xe7f   :  { %v872_v3 = vmul.f32 %v870_v25, %v866_v1  ;;  %v952_v25 = vld [vmem:[#allocation2 + $0x10] sm:$0xff] }
 0xe81   :  { %874 = vrot.lane.b32.xlu0 %v872_v3, %s1540_s18 }
 0xed3   :  { %v638_v26 = vpop.permute.xlu2 %637 }
 0xed4   :  { %v640_v5 = vadd.f32 %v638_v26, %v580_v51 }
 0xed6   :  { %1487 = vtanh.f32 %v640_v5 }
 0xedc   :  { %v1488_v27 = vpop.eup %1487 }
 0xedd   :  { %644 = vrot.lane.b32.xlu1 %v1488_v27, %s1541_s2 }
 0xef3   :  { %v875_v7 = vpop.permute.xlu0 %874 }
 0xef4   :  { %v877_v28 = vadd.f32 %v875_v7, %v819_v54  ;;  %v887_v54 = vld [vmem:[#allocation2 + $0x8] sm:$0xff] }
 0xef6   :  { %1489 = vtanh.f32 %v877_v28 }
 0xefc   :  { %v1490_v29 = vpop.eup %1489 }
 0xefd   :  { %881 = vrot.lane.b32.xlu2 %v1490_v29, %s1541_s2 }
 0xf4f   :  { %v645_v32 = vpop.permute.xlu1 %644 }
 0xf50   :  { %v647_v34 = vmul.f32 %v645_v32, %v642_v31 }
 0xf52   :  { %v1867_v40 = vadd.f32 %v648_v33, %v647_v34 }
 0xf54   :  { %651 = vrot.lane.b32.xlu0 %v1867_v40, %s1541_s2 }
 0xf57   :  { %v882_v42 = vpop.permute.xlu2 %881 }
 0xf58   :  { %v884_v44 = vmul.f32 %v882_v42, %v879_v41 }
 0xf5a   :  { %v886_v45 = vadd.f32 %v885_v43, %v884_v44 }
 0xf5c   :  { %889 = vrot.lane.b32.xlu1 %v886_v45, %s1541_s2 }
 0xfc6   :  { %v652_v48 = vpop.permute.xlu0 %651 }
 0xfc7   :  { %654 = vst.msk [vmem:[#allocation3 + $0x30] sm:$0xff] %vm54_vm0, %v652_v48  ;;  %1402 = vmatmul.msk.f32.vlgmr.msrb.gmra.mxu2 %vm54_vm0, %v652_v48 }
 0xfc8   :  { %1035 = vmatpush.msrb.mxu2 %v1806_v36 }
 0xfca   :  { %1036 = vmatpush.msrb.mxu2 %v1811_v37 }
 0xfcc   :  { %1037 = vmatpush.msrb.mxu2 %v1818_v38 }
 0xfce   :  { %v890_v35 = vpop.permute.xlu1 %889  ;;  %v736_v49 = vld [vmem:[#allocation3 + $0x30] sm:$0xff]  ;;  %1038 = vmatpush.msrb.mxu2 %v1825_v39 }
 0xfcf   :  { %1410 = vmatmul.msk.f32.gmra.mxu3 %vm54_vm0, %v736_v49  ;;  %1413 = vmatmul.msk.f32.vlgmr.msra.gmra.mxu2 %vm54_vm0, %v890_v35 }
 0xfd0   :  { %1165 = vmatpush.msra.mxu2 %v1806_v36 }
 0xfd2   :  { %1166 = vmatpush.msra.mxu2 %v1811_v37 }
 0xfd4   :  { %1167 = vmatpush.msra.mxu2 %v1818_v38 }
 0xfd6   :  { %1168 = vmatpush.msra.mxu2 %v1825_v39 }
0x104a   :  { %v1886_v10 = vpop.f32.mrf.mxu2 }
0x1052   :  { %v805_v50 = vpop.f32.mrf.mxu3  ;;  %v910_v51 = vpop.f32.mrf.mxu2 }
0x1053   :  { %v806_v52 = vadd.f32 %v1780_v61, %v805_v50  ;;  %v911_v53 = vadd.f32 %v1852_v9, %v910_v51 }
0x1055   :  { %817 = vst.msk [vmem:[#allocation2 + $0x30] sm:$0xff] %vm120_vm1, %v806_v52  ;;  %934 = vrot.lane.b32.xlu2 %v911_v53, %s1540_s18  ;;  %v913_v55 = vadd.f32 %v911_v53, %v887_v54 }
0x1057   :  { %v1414_v56 = vmul.f32 -1.442695, %v913_v55 }
0x1059   :  { %1491 = vpow2.f32 %v1414_v56 }
0x105f   :  { %v1492_v57 = vpop.eup %1491 }
0x1060   :  { %v917_v58 = vadd.f32 1.0, %v1492_v57 }
0x1062   :  { %1493 = vrcp.f32 %v917_v58  ;;  %v929_v2 = vand.u32 2147483648, %v917_v58  ;;  %vm923_vm7 = vweird.f32 %v917_v58  ;;  %v927_v4 = vand.u32 2147483647, %v917_v58 }
0x1064   :  { %v930_v8 = vor.u32 1.1754944e-38, %v929_v2  ;;  %vm928_vm9 = vcmp.eq.f32.partialorder %v927_v4, 8.507059e+37 }
0x1068   :  { %v1494_v59 = vpop.eup %1493 }
0x1069   :  { %v919_v60 = vmul.f32 %v1494_v59, %v917_v58  ;;  %vm924_vm6 = vweird.f32 %v1494_v59 }
0x106a   :  { %vm925_vm8 = vmor %vm923_vm7, %vm924_vm6 }
0x106b   :  { %v920_v62 = vsub.f32 1.0, %v919_v60 }
0x106d   :  { %v921_v63 = vmul.f32 %v1494_v59, %v920_v62 }
0x106f   :  { %v922_v0 = vadd.f32 %v1494_v59, %v921_v63 }
0x1071   :  { %v926_v6 = vsel %vm925_vm8, %v1494_v59, %v922_v0 }
0x1072   :  { %v931_v12 = vsel %vm928_vm9, %v930_v8, %v926_v6 }
0x1073   :  { %v944_v17 = vsub.f32 1.0, %v931_v12  ;;  %v950_v19 = vmul.f32 %v931_v12, %v886_v45 }
0x10af   :  { %v935_v11 = vpop.permute.xlu2 %934 }
0x10b0   :  { %v937_v13 = vmul.f32 %v935_v11, %v931_v12 }
0x10b2   :  { %939 = vrot.lane.b32.xlu0 %v937_v13, %s1540_s18 }
0x1124   :  { %v940_v14 = vpop.permute.xlu0 %939 }
0x1125   :  { %v942_v15 = vadd.f32 %v940_v14, %v887_v54  ;;  %v1017_v54 = vld [vmem:[#allocation2 + $0x18] sm:$0xff] }
0x1127   :  { %1495 = vtanh.f32 %v942_v15 }
0x112d   :  { %v1496_v16 = vpop.eup %1495 }
0x112e   :  { %946 = vrot.lane.b32.xlu1 %v1496_v16, %s1541_s2 }
0x11a0   :  { %v947_v18 = vpop.permute.xlu1 %946 }
0x11a1   :  { %v949_v20 = vmul.f32 %v947_v18, %v944_v17 }
0x11a3   :  { %v951_v21 = vadd.f32 %v950_v19, %v949_v20 }
0x11a5   :  { %954 = vrot.lane.b32.xlu2 %v951_v21, %s1541_s2 }
0x11ff   :  { %v955_v22 = vpop.permute.xlu2 %954 }
0x1200   :  { %1415 = vmatmul.msk.f32.vlgmr.msra.gmra.mxu1 %vm54_vm0, %v955_v22 }
0x1201   :  { %1230 = vmatpush.msra.mxu1 %v1806_v36 }
0x1203   :  { %1231 = vmatpush.msra.mxu1 %v1811_v37 }
0x1205   :  { %1232 = vmatpush.msra.mxu1 %v1818_v38 }
0x1207   :  { %1233 = vmatpush.msra.mxu1 %v1825_v39 }
0x127d   :  { %v975_v23 = vpop.f32.mrf.mxu1 }
0x127e   :  { %v976_v24 = vadd.f32 %v1852_v9, %v975_v23 }
0x1280   :  { %999 = vrot.lane.b32.xlu0 %v976_v24, %s1540_s18  ;;  %v978_v1 = vadd.f32 %v976_v24, %v952_v25 }
0x1282   :  { %v1416_v3 = vmul.f32 -1.442695, %v978_v1 }
0x1284   :  { %1497 = vpow2.f32 %v1416_v3 }
0x128a   :  { %v1498_v26 = vpop.eup %1497 }
0x128b   :  { %v982_v5 = vadd.f32 1.0, %v1498_v26 }
0x128d   :  { %1499 = vrcp.f32 %v982_v5  ;;  %v994_v31 = vand.u32 2147483648, %v982_v5  ;;  %vm988_vm11 = vweird.f32 %v982_v5  ;;  %v992_v32 = vand.u32 2147483647, %v982_v5 }
0x128f   :  { %v995_v34 = vor.u32 1.1754944e-38, %v994_v31  ;;  %vm993_vm13 = vcmp.eq.f32.partialorder %v992_v32, 8.507059e+37 }
0x1293   :  { %v1500_v27 = vpop.eup %1499 }
0x1294   :  { %v984_v7 = vmul.f32 %v1500_v27, %v982_v5  ;;  %vm989_vm10 = vweird.f32 %v1500_v27 }
0x1295   :  { %vm990_vm12 = vmor %vm988_vm11, %vm989_vm10 }
0x1296   :  { %v985_v28 = vsub.f32 1.0, %v984_v7 }
0x1298   :  { %v986_v29 = vmul.f32 %v1500_v27, %v985_v28 }
0x129a   :  { %v987_v30 = vadd.f32 %v1500_v27, %v986_v29 }
0x129c   :  { %v991_v33 = vsel %vm990_vm12, %v1500_v27, %v987_v30 }
0x129d   :  { %v996_v42 = vsel %vm993_vm13, %v995_v34, %v991_v33 }
0x129e   :  { %v1009_v47 = vsub.f32 1.0, %v996_v42  ;;  %v1015_v35 = vmul.f32 %v996_v42, %v951_v21  ;;  %v1082_v21 = vld [vmem:[#allocation2 + $0x20] sm:$0xff] }
0x12f2   :  { %v1000_v41 = vpop.permute.xlu0 %999 }
0x12f3   :  { %v1002_v43 = vmul.f32 %v1000_v41, %v996_v42 }
0x12f5   :  { %1004 = vrot.lane.b32.xlu1 %v1002_v43, %s1540_s18 }
0x1367   :  { %v1005_v44 = vpop.permute.xlu1 %1004 }
0x1368   :  { %v1007_v45 = vadd.f32 %v1005_v44, %v952_v25 }
0x136a   :  { %1501 = vtanh.f32 %v1007_v45 }
0x1370   :  { %v1502_v46 = vpop.eup %1501 }
0x1371   :  { %1011 = vrot.lane.b32.xlu2 %v1502_v46, %s1541_s2 }
0x13cb   :  { %v1012_v48 = vpop.permute.xlu2 %1011 }
0x13cc   :  { %v1014_v49 = vmul.f32 %v1012_v48, %v1009_v47 }
0x13ce   :  { %v1016_v50 = vadd.f32 %v1015_v35, %v1014_v49 }
0x13d0   :  { %1019 = vrot.lane.b32.xlu0 %v1016_v50, %s1541_s2 }
0x1442   :  { %v1020_v51 = vpop.permute.xlu0 %1019 }
0x1443   :  { %1417 = vmatmul.msk.f32.vlgmr.msrb.gmra.mxu2 %vm54_vm0, %v1020_v51 }
0x1444   :  { %1295 = vmatpush.msrb.mxu2 %v1806_v36 }
0x1446   :  { %1296 = vmatpush.msrb.mxu2 %v1811_v37 }
0x1448   :  { %1297 = vmatpush.msrb.mxu2 %v1818_v38 }
0x144a   :  { %1298 = vmatpush.msrb.mxu2 %v1825_v39 }
0x14c6   :  { %v1040_v52 = vpop.f32.mrf.mxu2 }
0x14c7   :  { %v1041_v53 = vadd.f32 %v1852_v9, %v1040_v52 }
0x14c9   :  { %1064 = vrot.lane.b32.xlu1 %v1041_v53, %s1540_s18  ;;  %v1043_v55 = vadd.f32 %v1041_v53, %v1017_v54 }
0x14cb   :  { %v1418_v56 = vmul.f32 -1.442695, %v1043_v55 }
0x14cd   :  { %1503 = vpow2.f32 %v1418_v56 }
0x14d3   :  { %v1504_v57 = vpop.eup %1503 }
0x14d4   :  { %v1047_v58 = vadd.f32 1.0, %v1504_v57 }
0x14d6   :  { %1505 = vrcp.f32 %v1047_v58  ;;  %v1059_v38 = vand.u32 2147483648, %v1047_v58  ;;  %vm1053_vm15 = vweird.f32 %v1047_v58  ;;  %v1057_v39 = vand.u32 2147483647, %v1047_v58 }
0x14d8   :  { %v1060_v0 = vor.u32 1.1754944e-38, %v1059_v38  ;;  %vm1058_vm3 = vcmp.eq.f32.partialorder %v1057_v39, 8.507059e+37 }
0x14dc   :  { %v1506_v59 = vpop.eup %1505 }
0x14dd   :  { %v1049_v36 = vmul.f32 %v1506_v59, %v1047_v58  ;;  %vm1054_vm14 = vweird.f32 %v1506_v59 }
0x14de   :  { %vm1055_vm2 = vmor %vm1053_vm15, %vm1054_vm14 }
0x14df   :  { %v1050_v60 = vsub.f32 1.0, %v1049_v36 }
0x14e1   :  { %v1051_v37 = vmul.f32 %v1506_v59, %v1050_v60 }
0x14e3   :  { %v1052_v62 = vadd.f32 %v1506_v59, %v1051_v37 }
0x14e5   :  { %v1056_v63 = vsel %vm1055_vm2, %v1506_v59, %v1052_v62 }
0x14e6   :  { %v1061_v4 = vsel %vm1058_vm3, %v1060_v0, %v1056_v63  ;;  %v1441_v0 = vld [vmem:[%s1979_s4] ss:$0 sm:$0xff] }
0x14e7   :  { %v1074_v13 = vsub.f32 1.0, %v1061_v4  ;;  %v1080_v15 = vmul.f32 %v1061_v4, %v1016_v50  ;;  %v1147_v50 = vld [vmem:[#allocation2 + $0x28] sm:$0xff] }
0x153b   :  { %v1065_v2 = vpop.permute.xlu1 %1064 }
0x153c   :  { %v1067_v6 = vmul.f32 %v1065_v2, %v1061_v4  ;;  %v684_v2 = vadd.f32 %v1441_v0, %v1886_v10 }
0x153e   :  { %1069 = vrot.lane.b32.xlu2 %v1067_v6, %s1540_s18 }
0x1598   :  { %v1070_v8 = vpop.permute.xlu2 %1069 }
0x1599   :  { %v1072_v11 = vadd.f32 %v1070_v8, %v1017_v54 }
0x159b   :  { %1507 = vtanh.f32 %v1072_v11  ;;  %v655_v11 = vld [vmem:[#allocation2 + $0x38] sm:$0xff] }
0x15a1   :  { %v1508_v12 = vpop.eup %1507 }
0x15a2   :  { %1076 = vrot.lane.b32.xlu0 %v1508_v12, %s1541_s2  ;;  %v686_v12 = vadd.f32 %v684_v2, %v655_v11 }
0x1614   :  { %v1077_v14 = vpop.permute.xlu0 %1076 }
0x1615   :  { %v1079_v16 = vmul.f32 %v1077_v14, %v1074_v13  ;;  %v1403_v13 = vmul.f32 -1.442695, %v686_v12 }
0x1617   :  { %v1081_v17 = vadd.f32 %v1080_v15, %v1079_v16 }
0x1619   :  { %1084 = vrot.lane.b32.xlu1 %v1081_v17, %s1541_s2 }
0x168b   :  { %v1085_v18 = vpop.permute.xlu1 %1084 }
0x168c   :  { %1419 = vmatmul.msk.f32.vlgmr.msrb.gmra.mxu1 %vm54_vm0, %v1085_v18 }
0x1709   :  { %v1105_v19 = vpop.f32.mrf.mxu1 }
0x170a   :  { %v1106_v20 = vadd.f32 %v1852_v9, %v1105_v19 }
0x170c   :  { %1129 = vrot.lane.b32.xlu2 %v1106_v20, %s1540_s18  ;;  %v1108_v22 = vadd.f32 %v1106_v20, %v1082_v21 }
0x170e   :  { %v1420_v23 = vmul.f32 -1.442695, %v1108_v22 }
0x1710   :  { %1509 = vpow2.f32 %v1420_v23 }
0x1716   :  { %v1510_v24 = vpop.eup %1509 }
0x1717   :  { %v1112_v25 = vadd.f32 1.0, %v1510_v24 }
0x1719   :  { %1511 = vrcp.f32 %v1112_v25  ;;  %v1124_v7 = vand.u32 2147483648, %v1112_v25  ;;  %vm1118_vm5 = vweird.f32 %v1112_v25  ;;  %v1122_v28 = vand.u32 2147483647, %v1112_v25 }
0x171b   :  { %v1125_v30 = vor.u32 1.1754944e-38, %v1124_v7  ;;  %vm1123_vm7 = vcmp.eq.f32.partialorder %v1122_v28, 8.507059e+37 }
0x171f   :  { %v1512_v1 = vpop.eup %1511 }
0x1720   :  { %v1114_v3 = vmul.f32 %v1512_v1, %v1112_v25  ;;  %vm1119_vm4 = vweird.f32 %v1512_v1 }
0x1721   :  { %vm1120_vm6 = vmor %vm1118_vm5, %vm1119_vm4 }
0x1722   :  { %v1115_v26 = vsub.f32 1.0, %v1114_v3 }
0x1724   :  { %v1116_v5 = vmul.f32 %v1512_v1, %v1115_v26 }
0x1726   :  { %v1117_v27 = vadd.f32 %v1512_v1, %v1116_v5 }
0x1728   :  { %v1121_v29 = vsel %vm1120_vm6, %v1512_v1, %v1117_v27 }
0x1729   :  { %v1126_v32 = vsel %vm1123_vm7, %v1125_v30, %v1121_v29 }
0x172a   :  { %v1139_v43 = vsub.f32 1.0, %v1126_v32  ;;  %v1145_v45 = vmul.f32 %v1126_v32, %v1081_v17 }
0x1766   :  { %v1130_v31 = vpop.permute.xlu2 %1129 }
0x1767   :  { %v1132_v33 = vmul.f32 %v1130_v31, %v1126_v32 }
0x1769   :  { %1134 = vrot.lane.b32.xlu0 %v1132_v33, %s1540_s18 }
0x17db   :  { %v1135_v34 = vpop.permute.xlu0 %1134 }
0x17dc   :  { %v1137_v41 = vadd.f32 %v1135_v34, %v1082_v21  ;;  %v1212_v34 = vld [vmem:[#allocation2 + $0x30] sm:$0xff] }
0x17de   :  { %1513 = vtanh.f32 %v1137_v41 }
0x17e4   :  { %v1514_v42 = vpop.eup %1513 }
0x17e5   :  { %1141 = vrot.lane.b32.xlu1 %v1514_v42, %s1541_s2 }
0x1857   :  { %v1142_v44 = vpop.permute.xlu1 %1141 }
0x1858   :  { %v1144_v46 = vmul.f32 %v1142_v44, %v1139_v43 }
0x185a   :  { %v1146_v47 = vadd.f32 %v1145_v45, %v1144_v46 }
0x185c   :  { %1149 = vrot.lane.b32.xlu2 %v1146_v47, %s1541_s2 }
0x18b6   :  { %v1150_v48 = vpop.permute.xlu2 %1149 }
0x18b7   :  { %1421 = vmatmul.msk.f32.vlgmr.msra.gmra.mxu2 %vm54_vm0, %v1150_v48 }
0x193a   :  { %v1170_v35 = vpop.f32.mrf.mxu2 }
0x193b   :  { %v1171_v49 = vadd.f32 %v1852_v9, %v1170_v35 }
0x193d   :  { %1194 = vrot.lane.b32.xlu0 %v1171_v49, %s1540_s18  ;;  %v1173_v51 = vadd.f32 %v1171_v49, %v1147_v50 }
0x193f   :  { %v1422_v52 = vmul.f32 -1.442695, %v1173_v51 }
0x1941   :  { %1515 = vpow2.f32 %v1422_v52 }
0x1947   :  { %v1516_v53 = vpop.eup %1515 }
0x1948   :  { %v1177_v54 = vadd.f32 1.0, %v1516_v53 }
0x194a   :  { %1517 = vrcp.f32 %v1177_v54  ;;  %v1189_v36 = vand.u32 2147483648, %v1177_v54  ;;  %vm1183_vm9 = vweird.f32 %v1177_v54  ;;  %v1187_v60 = vand.u32 2147483647, %v1177_v54 }
0x194c   :  { %v1190_v62 = vor.u32 1.1754944e-38, %v1189_v36  ;;  %vm1188_vm11 = vcmp.eq.f32.partialorder %v1187_v60, 8.507059e+37 }
0x1950   :  { %v1518_v55 = vpop.eup %1517 }
0x1951   :  { %v1179_v56 = vmul.f32 %v1518_v55, %v1177_v54  ;;  %vm1184_vm8 = vweird.f32 %v1518_v55 }
0x1952   :  { %vm1185_vm10 = vmor %vm1183_vm9, %vm1184_vm8  ;;  %vm1375_vm9 = vcmask 31744  }
0x1953   :  { %v1180_v57 = vsub.f32 1.0, %v1179_v56 }
0x1955   :  { %v1181_v58 = vmul.f32 %v1518_v55, %v1180_v57 }
0x1957   :  { %v1182_v59 = vadd.f32 %v1518_v55, %v1181_v58 }
0x1959   :  { %v1186_v37 = vsel %vm1185_vm10, %v1518_v55, %v1182_v59 }
0x195a   :  { %v1191_v39 = vsel %vm1188_vm11, %v1190_v62, %v1186_v37 }
0x195b   :  { %v1204_v10 = vsub.f32 1.0, %v1191_v39  ;;  %v1210_v21 = vmul.f32 %v1191_v39, %v1146_v47 }
0x19af   :  { %v1195_v38 = vpop.permute.xlu0 %1194 }
0x19b0   :  { %v1197_v63 = vmul.f32 %v1195_v38, %v1191_v39 }
0x19b2   :  { %1199 = vrot.lane.b32.xlu1 %v1197_v63, %s1540_s18 }
0x19ba   :  { %707 = vrot.lane.b32.xlu1 %v684_v2, %s1540_s18 }
0x1a24   :  { %v1200_v4 = vpop.permute.xlu1 %1199 }
0x1a25   :  { %v1202_v6 = vadd.f32 %v1200_v4, %v1147_v50 }
0x1a27   :  { %1519 = vtanh.f32 %v1202_v6 }
0x1a28   :  { %1521 = vpow2.f32 %v1403_v13 }
0x1a2c   :  { %v708_v26 = vpop.permute.xlu1 %707 }
0x1a2d   :  { %v1520_v8 = vpop.eup %1519 }
0x1a2e   :  { %1206 = vrot.lane.b32.xlu2 %v1520_v8, %s1541_s2  ;;  %v1522_v14 = vpop.eup %1521 }
0x1a2f   :  { %v690_v15 = vadd.f32 1.0, %v1522_v14 }
0x1a31   :  { %1523 = vrcp.f32 %v690_v15  ;;  %v702_v25 = vand.u32 2147483648, %v690_v15  ;;  %vm696_vm13 = vweird.f32 %v690_v15  ;;  %v700_v1 = vand.u32 2147483647, %v690_v15 }
0x1a33   :  { %v703_v5 = vor.u32 1.1754944e-38, %v702_v25  ;;  %vm701_vm15 = vcmp.eq.f32.partialorder %v700_v1, 8.507059e+37 }
0x1a37   :  { %v1524_v16 = vpop.eup %1523 }
0x1a38   :  { %v692_v17 = vmul.f32 %v1524_v16, %v690_v15  ;;  %vm697_vm12 = vweird.f32 %v1524_v16 }
0x1a39   :  { %vm698_vm14 = vmor %vm696_vm13, %vm697_vm12 }
0x1a3a   :  { %v693_v18 = vsub.f32 1.0, %v692_v17 }
0x1a3c   :  { %v694_v19 = vmul.f32 %v1524_v16, %v693_v18 }
0x1a3e   :  { %v695_v23 = vadd.f32 %v1524_v16, %v694_v19 }
0x1a40   :  { %v699_v3 = vsel %vm698_vm14, %v1524_v16, %v695_v23 }
0x1a41   :  { %v704_v27 = vsel %vm701_vm15, %v703_v5, %v699_v3 }
0x1a42   :  { %v710_v7 = vmul.f32 %v708_v26, %v704_v27  ;;  %v717_v56 = vsub.f32 1.0, %v704_v27  ;;  %v723_v58 = vmul.f32 %v704_v27, %v1867_v40 }
0x1a88   :  { %v1207_v20 = vpop.permute.xlu2 %1206 }
0x1a89   :  { %v1209_v22 = vmul.f32 %v1207_v20, %v1204_v10 }
0x1a8b   :  { %v1931_v24 = vadd.f32 %v1210_v21, %v1209_v22 }
0x1a8d   :  { %1214 = vrot.lane.b32.xlu0 %v1931_v24, %s1541_s2 }
0x1a95   :  { %712 = vrot.lane.b32.xlu0 %v710_v7, %s1540_s18  ;;  %v1345_v7 = vld [vmem:[%s1984_s9 + $0x18] sm:$0xff] }
0x1a96   :  { %1367 = vmatpush.msrb.mxu1 %v1345_v7 }
0x1aff   :  { %v1215_v28 = vpop.permute.xlu0 %1214 }
0x1b00   :  { %1423 = vmatmul.msk.f32.vlgmr.msra.gmra.mxu1 %vm54_vm0, %v1215_v28  ;;  %v1344_v28 = vld [vmem:[%s1984_s9 + $0x10] sm:$0xff] }
0x1b01   :  { %1368 = vmatpush.msrb.mxu1 %v1344_v28 }
0x1b07   :  { %v713_v29 = vpop.permute.xlu0 %712 }
0x1b08   :  { %v715_v30 = vadd.f32 %v713_v29, %v655_v11  ;;  %v1343_v29 = vld [vmem:[%s1984_s9 + $0x8] sm:$0xff] }
0x1b09   :  { %1369 = vmatpush.msrb.mxu1 %v1343_v29 }
0x1b0a   :  { %1525 = vtanh.f32 %v715_v30  ;;  %v1342_v30 = vld [vmem:[%s1984_s9] sm:$0xff] }
0x1b0b   :  { %1370 = vmatpush.msrb.mxu1 %v1342_v30 }
0x1b10   :  { %v1526_v33 = vpop.eup %1525 }
0x1b7d   :  { %v1235_v31 = vpop.f32.mrf.mxu1 }
0x1b7e   :  { %v1236_v32 = vadd.f32 %v1852_v9, %v1235_v31 }
0x1b80   :  { %1259 = vrot.lane.b32.xlu2 %v1236_v32, %s1540_s18  ;;  %v1238_v41 = vadd.f32 %v1236_v32, %v1212_v34 }
0x1b82   :  { %v1424_v42 = vmul.f32 -1.442695, %v1238_v41 }
0x1b84   :  { %1527 = vpow2.f32 %v1424_v42 }
0x1b88   :  { %719 = vrot.lane.b32.xlu2 %v1526_v33, %s1541_s2 }
0x1b8a   :  { %v1528_v43 = vpop.eup %1527 }
0x1b8b   :  { %v1242_v44 = vadd.f32 1.0, %v1528_v43  ;;  %v1442_v43 = vld [vmem:[%s1985_s10] ss:$0 sm:$0xff] }
0x1b8d   :  { %1529 = vrcp.f32 %v1242_v44  ;;  %v1254_v49 = vand.u32 2147483648, %v1242_v44  ;;  %vm1248_vm3 = vweird.f32 %v1242_v44  ;;  %v1252_v50 = vand.u32 2147483647, %v1242_v44 }
0x1b8f   :  { %v1255_v52 = vor.u32 1.1754944e-38, %v1254_v49  ;;  %vm1253_vm5 = vcmp.eq.f32.partialorder %v1252_v50, 8.507059e+37 }
0x1b93   :  { %v1530_v45 = vpop.eup %1529 }
0x1b94   :  { %v1244_v46 = vmul.f32 %v1530_v45, %v1242_v44  ;;  %vm1249_vm2 = vweird.f32 %v1530_v45 }
0x1b95   :  { %vm1250_vm4 = vmor %vm1248_vm3, %vm1249_vm2 }
0x1b96   :  { %v1245_v47 = vsub.f32 1.0, %v1244_v46 }
0x1b98   :  { %v1246_v48 = vmul.f32 %v1530_v45, %v1245_v47 }
0x1b9a   :  { %v1247_v35 = vadd.f32 %v1530_v45, %v1246_v48 }
0x1b9c   :  { %v1251_v51 = vsel %vm1250_vm4, %v1530_v45, %v1247_v35 }
0x1b9d   :  { %v1256_v54 = vsel %vm1253_vm5, %v1255_v52, %v1251_v51 }
0x1b9e   :  { %v1269_v63 = vsub.f32 1.0, %v1256_v54  ;;  %v1275_v40 = vmul.f32 %v1256_v54, %v1931_v24 }
0x1bda   :  { %v1260_v53 = vpop.permute.xlu2 %1259 }
0x1bdb   :  { %v1262_v55 = vmul.f32 %v1260_v53, %v1256_v54 }
0x1bdd   :  { %1264 = vrot.lane.b32.xlu1 %v1262_v55, %s1540_s18 }
0x1be2   :  { %v720_v57 = vpop.permute.xlu2 %719 }
0x1be3   :  { %v722_v59 = vmul.f32 %v720_v57, %v717_v56 }
0x1be5   :  { %v724_v36 = vadd.f32 %v723_v58, %v722_v59 }
0x1be7   :  { %726 = vrot.lane.b32.xlu1 %v724_v36, %s1541_s2 }
0x1c4f   :  { %v1265_v60 = vpop.permute.xlu1 %1264 }
0x1c50   :  { %v1267_v37 = vadd.f32 %v1265_v60, %v1212_v34 }
0x1c52   :  { %1531 = vtanh.f32 %v1267_v37 }
0x1c58   :  { %v1532_v62 = vpop.eup %1531 }
0x1c59   :  { %1271 = vrot.lane.b32.xlu0 %v1532_v62, %s1541_s2  ;;  %v727_v38 = vpop.permute.xlu1 %726 }
0x1c5a   :  { %729 = vst.msk [vmem:[#allocation3 + $0x38] sm:$0xff] %vm54_vm0, %v727_v38 }
0x1c61   :  { %v737_v39 = vld [vmem:[#allocation3 + $0x38] sm:$0xff] }
0x1c62   :  { %1411 = vmatmul.msk.f32.gmra.mxu3 %vm54_vm0, %v737_v39 }
0x1ccb   :  { %v1272_v0 = vpop.permute.xlu0 %1271 }
0x1ccc   :  { %v1274_v2 = vmul.f32 %v1272_v0, %v1269_v63 }
0x1cce   :  { %v1276_v4 = vadd.f32 %v1275_v40, %v1274_v2 }
0x1cd0   :  { %1279 = vrot.lane.b32.xlu2 %v1276_v4, %s1541_s2 }
0x1ce5   :  { %v808_v6 = vpop.f32.mrf.mxu3 }
0x1ce6   :  { %v809_v8 = vadd.f32 %v1780_v61, %v808_v6 }
0x1ce8   :  { %818 = vst.msk [vmem:[#allocation2 + $0x38] sm:$0xff] %vm120_vm1, %v809_v8 }
0x1cef   :  { %v1277_v14 = vld [vmem:[#allocation2 + $0x38] sm:$0xff] }
0x1d2a   :  { %v1280_v11 = vpop.permute.xlu2 %1279 }
0x1d2b   :  { %1425 = vmatmul.msk.f32.vlgmr.msrb.gmra.mxu2 %vm54_vm0, %v1280_v11 }
0x1dae   :  { %v1300_v12 = vpop.f32.mrf.mxu2 }
0x1daf   :  { %v1301_v13 = vadd.f32 %v1852_v9, %v1300_v12 }
0x1db1   :  { %1324 = vrot.lane.b32.xlu0 %v1301_v13, %s1540_s18  ;;  %v1303_v15 = vadd.f32 %v1301_v13, %v1277_v14 }
0x1db3   :  { %v1426_v16 = vmul.f32 -1.442695, %v1303_v15 }
0x1db5   :  { %1533 = vpow2.f32 %v1426_v16 }
0x1dbb   :  { %v1534_v17 = vpop.eup %1533 }
0x1dbc   :  { %v1307_v18 = vadd.f32 1.0, %v1534_v17 }
0x1dbe   :  { %1535 = vrcp.f32 %v1307_v18  ;;  %v1319_v22 = vand.u32 2147483648, %v1307_v18  ;;  %vm1313_vm6 = vweird.f32 %v1307_v18  ;;  %v1317_v23 = vand.u32 2147483647, %v1307_v18 }
0x1dc0   :  { %v1320_v24 = vor.u32 1.1754944e-38, %v1319_v22  ;;  %vm1318_vm8 = vcmp.eq.f32.partialorder %v1317_v23, 8.507059e+37 }
0x1dc4   :  { %v1536_v19 = vpop.eup %1535 }
0x1dc5   :  { %v1309_v10 = vmul.f32 %v1536_v19, %v1307_v18  ;;  %vm1314_vm1 = vweird.f32 %v1536_v19 }
0x1dc6   :  { %vm1315_vm7 = vmor %vm1313_vm6, %vm1314_vm1 }
0x1dc7   :  { %v1310_v61 = vsub.f32 1.0, %v1309_v10 }
0x1dc9   :  { %v1311_v20 = vmul.f32 %v1536_v19, %v1310_v61 }
0x1dcb   :  { %v1312_v21 = vadd.f32 %v1536_v19, %v1311_v20 }
0x1dcd   :  { %v1316_v9 = vsel %vm1315_vm7, %v1536_v19, %v1312_v21 }
0x1dce   :  { %v1321_v1 = vsel %vm1318_vm8, %v1320_v24, %v1316_v9 }
0x1dcf   :  { %v1334_v31 = vsub.f32 1.0, %v1321_v1  ;;  %v1340_v33 = vmul.f32 %v1321_v1, %v1276_v4 }
0x1e23   :  { %v1325_v25 = vpop.permute.xlu0 %1324 }
0x1e24   :  { %v1327_v3 = vmul.f32 %v1325_v25, %v1321_v1 }
0x1e26   :  { %1329 = vrot.lane.b32.xlu1 %v1327_v3, %s1540_s18 }
0x1e98   :  { %v1330_v26 = vpop.permute.xlu1 %1329 }
0x1e99   :  { %v1332_v5 = vadd.f32 %v1330_v26, %v1277_v14 }
0x1e9b   :  { %1537 = vtanh.f32 %v1332_v5 }
0x1ea1   :  { %v1538_v27 = vpop.eup %1537 }
0x1ea2   :  { %1336 = vrot.lane.b32.xlu2 %v1538_v27, %s1541_s2 }
0x1efc   :  { %v1337_v32 = vpop.permute.xlu2 %1336 }
0x1efd   :  { %v1339_v34 = vmul.f32 %v1337_v32, %v1334_v31 }
0x1eff   :  { %v1341_v41 = vadd.f32 %v1340_v33, %v1339_v34 }
0x1f01   :  { %1351 = vrot.lane.b32.xlu0 %v1341_v41, %s1541_s2 }
0x1f73   :  { %v1352_v42 = vpop.permute.xlu0 %1351 }
0x1f74   :  { %1427 = vmatmul.msk.f32.vlgmr.msrb.gmra.mxu1 %vm54_vm0, %v1352_v42 }
0x1ff1   :  { %v1372_v44 = vpop.f32.mrf.mxu1 }
0x1ff2   :  { %v1373_v45 = vadd.f32 %v1442_v43, %v1372_v44 }
0x1ff4   :  { %1376 = vst.msk [vmem:[%s1986_s11] sm:$0xff] %vm1375_vm9, %v1373_v45 }

</bundles_post_ra>
